<compile_context>
chip_gen: v7x
topology: tpu7x:2x2x1
jax: 0.10.0
libtpu: 0.0.40
codegen_flags: <defaults>
</compile_context>

<pallas_src>
import functools
import numpy as np
import jax
import jax.numpy as jnp
from jax.experimental import pallas as pl
from jax.experimental.pallas import tpu as pltpu


# ----------------------------------------------------------------------------- config
ANCHORS = [(8, 8), (12, 16), (16, 12), (24, 24), (32, 40),
           (40, 32), (48, 48), (56, 64), (64, 56)]          # 9 anchors in input pixels
ANCHORS_MASK = [[6, 7, 8], [3, 4, 5], [0, 1, 2]]
NUM_CLASSES = 3
BBOX_ATTRS = 5 + NUM_CLASSES
INPUT_SHAPE = (64, 64)          # network input H, W
L = 1                           # which feature level
BS = 2
IN_H = IN_W = 16
MAX_GT = 2                      # padded number of ground-truth boxes per image

BALANCE = [0.4, 1.0, 4]
BOX_RATIO = 0.05
OBJ_RATIO = 5 * (INPUT_SHAPE[0] * INPUT_SHAPE[1]) / 416 ** 2
CLS_RATIO = 1 * (NUM_CLASSES / 80)
IGNORE_THRESHOLD = 0.5

LANES = 128
SUBL = 8


# ----------------------------------------------------------------------------- numpy glue (target assignment)
def _iou_centers_np(box_a, box_b):
    """Pairwise IoU of boxes given in (cx, cy, w, h) format."""
    ca = np.stack([box_a[:, 0] - box_a[:, 2] / 2, box_a[:, 1] - box_a[:, 3] / 2,
                   box_a[:, 0] + box_a[:, 2] / 2, box_a[:, 1] + box_a[:, 3] / 2], axis=1)
    cb = np.stack([box_b[:, 0] - box_b[:, 2] / 2, box_b[:, 1] - box_b[:, 3] / 2,
                   box_b[:, 0] + box_b[:, 2] / 2, box_b[:, 1] + box_b[:, 3] / 2], axis=1)
    max_xy = np.minimum(ca[:, None, 2:], cb[None, :, 2:])
    min_xy = np.maximum(ca[:, None, :2], cb[None, :, :2])
    inter = np.clip(max_xy - min_xy, 0, None)
    inter = inter[:, :, 0] * inter[:, :, 1]
    area_a = ((ca[:, 2] - ca[:, 0]) * (ca[:, 3] - ca[:, 1]))[:, None]
    area_b = ((cb[:, 2] - cb[:, 0]) * (cb[:, 3] - cb[:, 1]))[None, :]
    return inter / (area_a + area_b - inter)


def _get_target_np(l, targets, scaled_anchors, in_h, in_w, bs, max_gt):
    # TODO(synk): data-dependent scatter over a few GT boxes; kept as numpy glue.
    na = len(ANCHORS_MASK[l])
    noobj = np.ones((bs, na, in_h, in_w), np.float32)
    y_true = np.zeros((bs, na, in_h, in_w, BBOX_ATTRS), np.float32)
    gt = np.zeros((bs, max_gt, 5), np.float32)        # (cx, cy, w, h, valid) in feature coords
    anchor_shapes = np.concatenate(
        [np.zeros((len(scaled_anchors), 2), np.float32),
         np.asarray(scaled_anchors, np.float32)], axis=1)
    for b in range(bs):
        tb = np.asarray(targets[b], np.float32)
        if tb.shape[0] == 0:
            continue
        bt = np.zeros_like(tb)
        bt[:, [0, 2]] = tb[:, [0, 2]] * in_w
        bt[:, [1, 3]] = tb[:, [1, 3]] * in_h
        bt[:, 4] = tb[:, 4]
        ngt = min(tb.shape[0], max_gt)
        gt[b, :ngt, :4] = bt[:ngt, :4]
        gt[b, :ngt, 4] = 1.0
        gt_box = np.concatenate([np.zeros((bt.shape[0], 2), np.float32), bt[:, 2:4]], axis=1)
        best_ns = np.argmax(_iou_centers_np(gt_box, anchor_shapes), axis=-1)
        for t, best_n in enumerate(best_ns):
            if best_n not in ANCHORS_MASK[l]:
                continue
            k = ANCHORS_MASK[l].index(best_n)
            i = int(np.floor(bt[t, 0]))
            j = int(np.floor(bt[t, 1]))
            c = int(bt[t, 4])
            noobj[b, k, j, i] = 0.0
            y_true[b, k, j, i, 0:4] = bt[t, 0:4]
            y_true[b, k, j, i, 4] = 1.0
            y_true[b, k, j, i, c + 5] = 1.0
    return y_true, noobj, gt


# ----------------------------------------------------------------------------- Pallas kernel
def _yolo_loss_kernel(pred_ref, ytrue_ref, gxy_ref, noobj_ref, gt_ref,
                      out_ref, acc_ref, *,
                      bs, C, max_gt, ignore_thresh,
                      box_ratio, obj_ratio, cls_ratio, balance_l):
    step = pl.program_id(0)

    @pl.when(step == 0)
    def _():
        acc_ref[...] = jnp.zeros_like(acc_ref)

    pred = pred_ref[...]      # (5+C, TR, 128)  raw logits
    ytrue = ytrue_ref[...]    # (5+C, TR, 128)
    gxy = gxy_ref[...]        # (5,   TR, 128)  [grid_x, grid_y, anchor_w, anchor_h, batch_idx]
    noobj = noobj_ref[0]      # (TR, 128)

    gx, gy, aw, ah, bidx = gxy[0], gxy[1], gxy[2], gxy[3], gxy[4]

    # ---- decode prediction boxes (feature-map coordinates); x/y need true sigmoids
    x = jax.nn.sigmoid(pred[0])
    y = jax.nn.sigmoid(pred[1])
    pbx = x + gx
    pby = y + gy
    pbw = jnp.exp(pred[2]) * aw
    pbh = jnp.exp(pred[3]) * ah
    px1 = pbx - pbw * 0.5
    px2 = pbx + pbw * 0.5
    py1 = pby - pbh * 0.5
    py2 = pby + pbh * 0.5
    pred_area = pbw * pbh

    # ---- get_ignore: any GT box with IoU > thr suppresses noobj.
    #      (inter > thr*union) == (iou > thr) because union > 0 — no divides.
    hit = None
    for b in range(bs):
        in_b = bidx == float(b)
        for t in range(max_gt):
            base = (b * max_gt + t) * 5
            cx = gt_ref[base + 0]
            cy = gt_ref[base + 1]
            gw = gt_ref[base + 2]
            gh = gt_ref[base + 3]
            valid = gt_ref[base + 4]
            ax1 = cx - gw * 0.5
            ax2 = cx + gw * 0.5
            ay1 = cy - gh * 0.5
            ay2 = cy + gh * 0.5
            iw = jnp.maximum(jnp.minimum(ax2, px2) - jnp.maximum(ax1, px1), 0.0)
            ih = jnp.maximum(jnp.minimum(ay2, py2) - jnp.maximum(ay1, py1), 0.0)
            inter = iw * ih
            union = gw * gh + pred_area - inter
            cond = jnp.logical_and(
                in_b, jnp.logical_and(valid > 0.5, inter > ignore_thresh * union))
            hit = cond if hit is None else jnp.logical_or(hit, cond)
    if hit is not None:
        noobj = jnp.where(hit, 0.0, noobj)

    obj = ytrue[4] == 1.0                     # (TR, 128) bool
    obj_f = obj.astype(jnp.float32)

    # ---- GIoU between decoded pred boxes and y_true boxes
    tx, ty, tw, th = ytrue[0], ytrue[1], ytrue[2], ytrue[3]
    tx1 = tx - tw * 0.5
    tx2 = tx + tw * 0.5
    ty1 = ty - th * 0.5
    ty2 = ty + th * 0.5
    iw = jnp.maximum(jnp.minimum(px2, tx2) - jnp.maximum(px1, tx1), 0.0)
    ih = jnp.maximum(jnp.minimum(py2, ty2) - jnp.maximum(py1, ty1), 0.0)
    inter = iw * ih
    union = pred_area + tw * th - inter
    iou = inter / union
    ew = jnp.maximum(jnp.maximum(px2, tx2) - jnp.minimum(px1, tx1), 0.0)
    eh = jnp.maximum(jnp.maximum(py2, ty2) - jnp.minimum(py1, ty1), 0.0)
    enclose = ew * eh
    giou = iou - (enclose - union) / enclose

    # ---- BCE from logits: max(z,0) - z*t + log(1 + exp(-|z|))
    def bce_logits(z, t):
        return jnp.maximum(z, 0.0) - z * t + jnp.log(1.0 + jnp.exp(-jnp.abs(z)))

    cls_bce = None                            # sum of per-class BCE at each cell
    for c in range(C):
        term = bce_logits(pred[5 + c], ytrue[5 + c])
        cls_bce = term if cls_bce is None else cls_bce + term
    bce_conf = bce_logits(pred[4], obj_f)

    sel = jnp.logical_or(noobj > 0.5, obj)
    sel_f = sel.astype(jnp.float32)

    # ---- per-block partial sums (sublane reduce only), one full-vreg accumulate
    lanes = pred.shape[2]
    r_loc = jnp.sum(jnp.where(obj, 1.0 - giou, 0.0), axis=0, keepdims=True)
    r_n = jnp.sum(obj_f, axis=0, keepdims=True)
    r_cls = jnp.sum(jnp.where(obj, cls_bce, 0.0), axis=0, keepdims=True)
    r_cnf = jnp.sum(jnp.where(sel, bce_conf, 0.0), axis=0, keepdims=True)
    r_sel = jnp.sum(sel_f, axis=0, keepdims=True)
    pad = jnp.zeros((3, lanes), jnp.float32)
    acc_ref[...] += jnp.concatenate([r_loc, r_n, r_cls, r_cnf, r_sel, pad], axis=0)

    # ---- finalize on the last block
    @pl.when(step == pl.num_programs(0) - 1)
    def _():
        totals = jnp.sum(acc_ref[...], axis=1, keepdims=True)   # (8, 1)
        sum_loc = totals[0:1, :]
        n_obj = totals[1:2, :]
        sum_cls = totals[2:3, :]
        sum_conf = totals[3:4, :]
        cnt_conf = totals[4:5, :]
        n_safe = jnp.maximum(n_obj, 1.0)
        loss_loc = sum_loc / n_safe
        loss_cls = sum_cls / (n_safe * float(C))
        obj_part = jnp.where(n_obj > 0.0,
                             loss_loc * box_ratio + loss_cls * cls_ratio, 0.0)
        loss_conf = sum_conf / jnp.maximum(cnt_conf, 1.0)
        out_ref[...] = obj_part + loss_conf * (balance_l * obj_ratio)


# ----------------------------------------------------------------------------- wrapper
def yolo_loss(l, inp, targets):
    """inp: (bs, 3*(5+C), H, W) float32 (NCHW, as in PyTorch). targets: list of (n,5) numpy arrays."""
    bs, _, in_h, in_w = inp.shape
    na = len(ANCHORS_MASK[l])
    A = BBOX_ATTRS
    stride_h = INPUT_SHAPE[0] / in_h
    stride_w = INPUT_SHAPE[1] / in_w
    scaled_anchors = [(aw / stride_w, ah / stride_h) for aw, ah in ANCHORS]

    # target assignment (numpy glue, mirrors get_target)
    y_true, noobj0, gt = _get_target_np(l, targets, scaled_anchors, in_h, in_w, bs, MAX_GT)

    N = bs * na * in_h * in_w
    TILE = SUBL * LANES                              # 1024 pixels per (8,128) tile
    N_pad = ((N + TILE - 1) // TILE) * TILE
    R = N_pad // LANES
    TR = SUBL
    num_blocks = R // TR

    # grid / anchor / batch-index maps, flattened + padded to (5, R, 128)
    shape4 = (bs, na, in_h, in_w)
    grid_x = np.broadcast_to(np.arange(in_w, dtype=np.float32)[None, None, None, :], shape4)
    grid_y = np.broadcast_to(np.arange(in_h, dtype=np.float32)[None, None, :, None], shape4)
    sa_l = np.asarray(scaled_anchors, np.float32)[ANCHORS_MASK[l]]          # (na, 2)
    anchor_w = np.broadcast_to(sa_l[:, 0][None, :, None, None], shape4)
    anchor_h = np.broadcast_to(sa_l[:, 1][None, :, None, None], shape4)
    bidx = np.broadcast_to(np.arange(bs, dtype=np.float32)[:, None, None, None], shape4)

    gxy = np.zeros((5, N_pad), np.float32)
    gxy[2, :] = 1.0          # padded anchor_w/h -> decode stays finite & positive
    gxy[3, :] = 1.0
    gxy[4, :] = -1.0         # padded batch index: never matches a real batch
    gxy[0, :N] = grid_x.reshape(-1)
    gxy[1, :N] = grid_y.reshape(-1)
    gxy[2, :N] = anchor_w.reshape(-1)
    gxy[3, :N] = anchor_h.reshape(-1)
    gxy[4, :N] = bidx.reshape(-1)
    gxy = gxy.reshape(5, R, LANES)

    ytrue_p = np.zeros((A, N_pad), np.float32)
    ytrue_p[:, :N] = np.transpose(y_true, (4, 0, 1, 2, 3)).reshape(A, N)
    ytrue_p = ytrue_p.reshape(A, R, LANES)

    noobj_p = np.zeros((1, N_pad), np.float32)
    noobj_p[0, :N] = noobj0.reshape(-1)
    noobj_p = noobj_p.reshape(1, R, LANES)

    # prediction: single transpose to attribute-major, pad, (A, R, 128)
    pred = jnp.asarray(inp, jnp.float32).reshape(bs, na, A, in_h * in_w)
    pred = jnp.transpose(pred, (2, 0, 1, 3)).reshape(A, N)
    pred = jnp.pad(pred, ((0, 0), (0, N_pad - N))).reshape(A, R, LANES)

    gt_flat = jnp.asarray(gt.reshape(-1))            # (bs*MAX_GT*5,) SMEM scalars

    kernel = functools.partial(
        _yolo_loss_kernel,
        bs=bs, C=NUM_CLASSES, max_gt=MAX_GT,
        ignore_thresh=IGNORE_THRESHOLD, box_ratio=BOX_RATIO,
        obj_ratio=OBJ_RATIO, cls_ratio=CLS_RATIO, balance_l=float(BALANCE[l]))

    out = pl.pallas_call(
        kernel,
        grid=(num_blocks,),
        out_shape=jax.ShapeDtypeStruct((1, 1), jnp.float32),
        in_specs=[
            pl.BlockSpec((A, TR, LANES), lambda i: (0, i, 0)),   # pred logits
            pl.BlockSpec((A, TR, LANES), lambda i: (0, i, 0)),   # y_true
            pl.BlockSpec((5, TR, LANES), lambda i: (0, i, 0)),   # grid/anchor/batch maps
            pl.BlockSpec((1, TR, LANES), lambda i: (0, i, 0)),   # initial noobj mask
            pl.BlockSpec(memory_space=pltpu.MemorySpace.SMEM),   # padded GT boxes (scalars)
        ],
        out_specs=pl.BlockSpec((1, 1), lambda i: (0, 0)),
        scratch_shapes=[pltpu.VMEM((SUBL, LANES), jnp.float32)],
        compiler_params=pltpu.CompilerParams(
            dimension_semantics=("arbitrary",)),
    )(pred, jnp.asarray(ytrue_p), jnp.asarray(gxy), jnp.asarray(noobj_p), gt_flat)
    return out[0, 0]


# ----------------------------------------------------------------------------- main
if __name__ == "__main__":
    key = jax.random.PRNGKey(0)
    x = jax.random.normal(key, (BS, 3 * BBOX_ATTRS, IN_H, IN_W), dtype=jnp.float32)
    # deterministic ground-truth boxes: (cx, cy, w, h) normalized to [0,1] + class id
    targets = [
        np.array([[0.50, 0.50, 0.30, 0.40, 1.0],
                  [0.20, 0.30, 0.10, 0.15, 0.0]], dtype=np.float32),
        np.array([[0.70, 0.60, 0.35, 0.30, 2.0]], dtype=np.float32),
    ]

    loss = yolo_loss(L, x, targets)
    loss = jax.block_until_ready(loss)
    assert np.isfinite(np.asarray(loss)), "loss is not finite"
    print("KERNEL_OK")
</pallas_src>

<mosaic_0001>
module attributes {stable_mosaic.version = 11 : i64} {
  func.func @_yolo_loss_kernel(%arg0: i32, %arg1: memref<8x8x128xf32, #tpu.memory_space<vmem>>, %arg2: memref<8x8x128xf32, #tpu.memory_space<vmem>>, %arg3: memref<5x8x128xf32, #tpu.memory_space<vmem>>, %arg4: memref<1x8x128xf32, #tpu.memory_space<vmem>>, %arg5: memref<20xf32, #tpu.memory_space<smem>>, %arg6: memref<1x1xf32, #tpu.memory_space<vmem>>, %arg7: memref<8x128xf32, #tpu.memory_space<vmem>>) attributes {dimension_semantics = [#tpu.dimension_semantics<arbitrary>], iteration_bounds = array<i64: 2>, scalar_prefetch = 0 : i64, scratch_operands = 1 : i64, tpu.core_type = #tpu.core_type<tc>, window_params = [{transform_indices = @transform_0, window_bounds = array<i64: 8, 8, 128>}, {transform_indices = @transform_1, window_bounds = array<i64: 8, 8, 128>}, {transform_indices = @transform_2, window_bounds = array<i64: 5, 8, 128>}, {transform_indices = @transform_3, window_bounds = array<i64: 1, 8, 128>}, {transform_indices = @transform_4, window_bounds = array<i64: 20>}, {pipeline_mode = #tpu.pipeline_mode<synchronous>, transform_indices = @transform_5, window_bounds = array<i64: 1, 1>}]} {
    %c0_i32 = arith.constant 0 : i32
    %0 = arith.cmpi eq, %arg0, %c0_i32 : i32
    %1 = arith.extui %0 : i1 to i32
    %c0_i32_0 = arith.constant 0 : i32
    %2 = arith.cmpi ne, %1, %c0_i32_0 : i32
    scf.if %2 {
      %cst_90 = arith.constant 0.000000e+00 : f32
      %370 = vector.broadcast %cst_90 : f32 to vector<8x128xf32>
      %c0_91 = arith.constant 0 : index
      %c0_92 = arith.constant 0 : index
      %371 = vector.load %arg7[%c0_91, %c0_92] : memref<8x128xf32, #tpu.memory_space<vmem>>, vector<8x128xf32>
      tpu.vector_store %arg7[%c0_91, %c0_92], %370 {strides = array<i32>} : memref<8x128xf32, #tpu.memory_space<vmem>>, vector<8x128xf32>,
    } else {
    }
    %c0 = arith.constant 0 : index
    %c0_1 = arith.constant 0 : index
    %c0_2 = arith.constant 0 : index
    %3 = vector.load %arg1[%c0, %c0_1, %c0_2] : memref<8x8x128xf32, #tpu.memory_space<vmem>>, vector<8x8x128xf32>
    %c0_3 = arith.constant 0 : index
    %c0_4 = arith.constant 0 : index
    %c0_5 = arith.constant 0 : index
    %4 = vector.load %arg2[%c0_3, %c0_4, %c0_5] : memref<8x8x128xf32, #tpu.memory_space<vmem>>, vector<8x8x128xf32>
    %c0_6 = arith.constant 0 : index
    %c0_7 = arith.constant 0 : index
    %c0_8 = arith.constant 0 : index
    %5 = vector.load %arg3[%c0_6, %c0_7, %c0_8] : memref<5x8x128xf32, #tpu.memory_space<vmem>>, vector<5x8x128xf32>
    %c0_9 = arith.constant 0 : index
    %c0_10 = arith.constant 0 : index
    %c0_11 = arith.constant 0 : index
    %6 = vector.load %arg4[%c0_9, %c0_10, %c0_11] : memref<1x8x128xf32, #tpu.memory_space<vmem>>, vector<1x8x128xf32>
    %7 = vector.shape_cast %6 : vector<1x8x128xf32> to vector<8x128xf32>
    %8 = vector.extract_strided_slice %5 {offsets = [0, 0, 0], sizes = [1, 8, 128], strides = [1, 1, 1]} : vector<5x8x128xf32> to vector<1x8x128xf32>
    %9 = vector.shape_cast %8 : vector<1x8x128xf32> to vector<8x128xf32>
    %10 = vector.extract_strided_slice %5 {offsets = [1, 0, 0], sizes = [1, 8, 128], strides = [1, 1, 1]} : vector<5x8x128xf32> to vector<1x8x128xf32>
    %11 = vector.shape_cast %10 : vector<1x8x128xf32> to vector<8x128xf32>
    %12 = vector.extract_strided_slice %5 {offsets = [2, 0, 0], sizes = [1, 8, 128], strides = [1, 1, 1]} : vector<5x8x128xf32> to vector<1x8x128xf32>
    %13 = vector.shape_cast %12 : vector<1x8x128xf32> to vector<8x128xf32>
    %14 = vector.extract_strided_slice %5 {offsets = [3, 0, 0], sizes = [1, 8, 128], strides = [1, 1, 1]} : vector<5x8x128xf32> to vector<1x8x128xf32>
    %15 = vector.shape_cast %14 : vector<1x8x128xf32> to vector<8x128xf32>
    %16 = vector.extract_strided_slice %5 {offsets = [4, 0, 0], sizes = [1, 8, 128], strides = [1, 1, 1]} : vector<5x8x128xf32> to vector<1x8x128xf32>
    %17 = vector.shape_cast %16 : vector<1x8x128xf32> to vector<8x128xf32>
    %18 = vector.extract_strided_slice %3 {offsets = [0, 0, 0], sizes = [1, 8, 128], strides = [1, 1, 1]} : vector<8x8x128xf32> to vector<1x8x128xf32>
    %19 = vector.shape_cast %18 : vector<1x8x128xf32> to vector<8x128xf32>
    %20 = arith.negf %19 : vector<8x128xf32>
    %21 = math.exp %20 : vector<8x128xf32>
    %cst = arith.constant 1.000000e+00 : f32
    %22 = vector.broadcast %cst : f32 to vector<8x128xf32>
    %23 = arith.addf %22, %21 : vector<8x128xf32>
    %24 = arith.divf %22, %23 : vector<8x128xf32>
    %25 = vector.extract_strided_slice %3 {offsets = [1, 0, 0], sizes = [1, 8, 128], strides = [1, 1, 1]} : vector<8x8x128xf32> to vector<1x8x128xf32>
    %26 = vector.shape_cast %25 : vector<1x8x128xf32> to vector<8x128xf32>
    %27 = arith.negf %26 : vector<8x128xf32>
    %28 = math.exp %27 : vector<8x128xf32>
    %cst_12 = arith.constant 1.000000e+00 : f32
    %29 = vector.broadcast %cst_12 : f32 to vector<8x128xf32>
    %30 = arith.addf %29, %28 : vector<8x128xf32>
    %31 = arith.divf %29, %30 : vector<8x128xf32>
    %32 = arith.addf %24, %9 : vector<8x128xf32>
    %33 = arith.addf %31, %11 : vector<8x128xf32>
    %34 = vector.extract_strided_slice %3 {offsets = [2, 0, 0], sizes = [1, 8, 128], strides = [1, 1, 1]} : vector<8x8x128xf32> to vector<1x8x128xf32>
    %35 = vector.shape_cast %34 : vector<1x8x128xf32> to vector<8x128xf32>
    %36 = math.exp %35 : vector<8x128xf32>
    %37 = arith.mulf %36, %13 : vector<8x128xf32>
    %38 = vector.extract_strided_slice %3 {offsets = [3, 0, 0], sizes = [1, 8, 128], strides = [1, 1, 1]} : vector<8x8x128xf32> to vector<1x8x128xf32>
    %39 = vector.shape_cast %38 : vector<1x8x128xf32> to vector<8x128xf32>
    %40 = math.exp %39 : vector<8x128xf32>
    %41 = arith.mulf %40, %15 : vector<8x128xf32>
    %cst_13 = arith.constant 5.000000e-01 : f32
    %42 = vector.broadcast %cst_13 : f32 to vector<8x128xf32>
    %43 = arith.mulf %37, %42 : vector<8x128xf32>
    %44 = arith.subf %32, %43 : vector<8x128xf32>
    %cst_14 = arith.constant 5.000000e-01 : f32
    %45 = vector.broadcast %cst_14 : f32 to vector<8x128xf32>
    %46 = arith.mulf %37, %45 : vector<8x128xf32>
    %47 = arith.addf %32, %46 : vector<8x128xf32>
    %cst_15 = arith.constant 5.000000e-01 : f32
    %48 = vector.broadcast %cst_15 : f32 to vector<8x128xf32>
    %49 = arith.mulf %41, %48 : vector<8x128xf32>
    %50 = arith.subf %33, %49 : vector<8x128xf32>
    %cst_16 = arith.constant 5.000000e-01 : f32
    %51 = vector.broadcast %cst_16 : f32 to vector<8x128xf32>
    %52 = arith.mulf %41, %51 : vector<8x128xf32>
    %53 = arith.addf %33, %52 : vector<8x128xf32>
    %54 = arith.mulf %37, %41 : vector<8x128xf32>
    %cst_17 = arith.constant 0.000000e+00 : f32
    %55 = vector.broadcast %cst_17 : f32 to vector<8x128xf32>
    %56 = arith.cmpf oeq, %17, %55 : vector<8x128xf32>
    %c0_18 = arith.constant 0 : index
    %57 = memref.load %arg5[%c0_18] : memref<20xf32, #tpu.memory_space<smem>>
    %c1 = arith.constant 1 : index
    %58 = memref.load %arg5[%c1] : memref<20xf32, #tpu.memory_space<smem>>
    %c2 = arith.constant 2 : index
    %59 = memref.load %arg5[%c2] : memref<20xf32, #tpu.memory_space<smem>>
    %c3 = arith.constant 3 : index
    %60 = memref.load %arg5[%c3] : memref<20xf32, #tpu.memory_space<smem>>
    %c4 = arith.constant 4 : index
    %61 = memref.load %arg5[%c4] : memref<20xf32, #tpu.memory_space<smem>>
    %cst_19 = arith.constant 5.000000e-01 : f32
    %62 = arith.mulf %59, %cst_19 : f32
    %63 = arith.subf %57, %62 : f32
    %cst_20 = arith.constant 5.000000e-01 : f32
    %64 = arith.mulf %59, %cst_20 : f32
    %65 = arith.addf %57, %64 : f32
    %cst_21 = arith.constant 5.000000e-01 : f32
    %66 = arith.mulf %60, %cst_21 : f32
    %67 = arith.subf %58, %66 : f32
    %cst_22 = arith.constant 5.000000e-01 : f32
    %68 = arith.mulf %60, %cst_22 : f32
    %69 = arith.addf %58, %68 : f32
    %70 = vector.broadcast %65 : f32 to vector<8x128xf32>
    %71 = arith.minimumf %70, %47 : vector<8x128xf32>
    %72 = vector.broadcast %63 : f32 to vector<8x128xf32>
    %73 = arith.maximumf %72, %44 : vector<8x128xf32>
    %74 = arith.subf %71, %73 : vector<8x128xf32>
    %cst_23 = arith.constant 0.000000e+00 : f32
    %75 = vector.broadcast %cst_23 : f32 to vector<8x128xf32>
    %76 = arith.maximumf %74, %75 : vector<8x128xf32>
    %77 = vector.broadcast %69 : f32 to vector<8x128xf32>
    %78 = arith.minimumf %77, %53 : vector<8x128xf32>
    %79 = vector.broadcast %67 : f32 to vector<8x128xf32>
    %80 = arith.maximumf %79, %50 : vector<8x128xf32>
    %81 = arith.subf %78, %80 : vector<8x128xf32>
    %cst_24 = arith.constant 0.000000e+00 : f32
    %82 = vector.broadcast %cst_24 : f32 to vector<8x128xf32>
    %83 = arith.maximumf %81, %82 : vector<8x128xf32>
    %84 = arith.mulf %76, %83 : vector<8x128xf32>
    %85 = arith.mulf %59, %60 : f32
    %86 = vector.broadcast %85 : f32 to vector<8x128xf32>
    %87 = arith.addf %86, %54 : vector<8x128xf32>
    %88 = arith.subf %87, %84 : vector<8x128xf32>
    %cst_25 = arith.constant 5.000000e-01 : f32
    %89 = arith.cmpf ogt, %61, %cst_25 : f32
    %cst_26 = arith.constant 5.000000e-01 : f32
    %90 = vector.broadcast %cst_26 : f32 to vector<8x128xf32>
    %91 = arith.mulf %90, %88 : vector<8x128xf32>
    %92 = arith.cmpf ogt, %84, %91 : vector<8x128xf32>
    %93 = vector.broadcast %89 : i1 to vector<8x128xi1>
    %94 = arith.andi %93, %92 : vector<8x128xi1>
    %95 = arith.andi %56, %94 : vector<8x128xi1>
    %c5 = arith.constant 5 : index
    %96 = memref.load %arg5[%c5] : memref<20xf32, #tpu.memory_space<smem>>
    %c6 = arith.constant 6 : index
    %97 = memref.load %arg5[%c6] : memref<20xf32, #tpu.memory_space<smem>>
    %c7 = arith.constant 7 : index
    %98 = memref.load %arg5[%c7] : memref<20xf32, #tpu.memory_space<smem>>
    %c8 = arith.constant 8 : index
    %99 = memref.load %arg5[%c8] : memref<20xf32, #tpu.memory_space<smem>>
    %c9 = arith.constant 9 : index
    %100 = memref.load %arg5[%c9] : memref<20xf32, #tpu.memory_space<smem>>
    %cst_27 = arith.constant 5.000000e-01 : f32
    %101 = arith.mulf %98, %cst_27 : f32
    %102 = arith.subf %96, %101 : f32
    %cst_28 = arith.constant 5.000000e-01 : f32
    %103 = arith.mulf %98, %cst_28 : f32
    %104 = arith.addf %96, %103 : f32
    %cst_29 = arith.constant 5.000000e-01 : f32
    %105 = arith.mulf %99, %cst_29 : f32
    %106 = arith.subf %97, %105 : f32
    %cst_30 = arith.constant 5.000000e-01 : f32
    %107 = arith.mulf %99, %cst_30 : f32
    %108 = arith.addf %97, %107 : f32
    %109 = vector.broadcast %104 : f32 to vector<8x128xf32>
    %110 = arith.minimumf %109, %47 : vector<8x128xf32>
    %111 = vector.broadcast %102 : f32 to vector<8x128xf32>
    %112 = arith.maximumf %111, %44 : vector<8x128xf32>
    %113 = arith.subf %110, %112 : vector<8x128xf32>
    %cst_31 = arith.constant 0.000000e+00 : f32
    %114 = vector.broadcast %cst_31 : f32 to vector<8x128xf32>
    %115 = arith.maximumf %113, %114 : vector<8x128xf32>
    %116 = vector.broadcast %108 : f32 to vector<8x128xf32>
    %117 = arith.minimumf %116, %53 : vector<8x128xf32>
    %118 = vector.broadcast %106 : f32 to vector<8x128xf32>
    %119 = arith.maximumf %118, %50 : vector<8x128xf32>
    %120 = arith.subf %117, %119 : vector<8x128xf32>
    %cst_32 = arith.constant 0.000000e+00 : f32
    %121 = vector.broadcast %cst_32 : f32 to vector<8x128xf32>
    %122 = arith.maximumf %120, %121 : vector<8x128xf32>
    %123 = arith.mulf %115, %122 : vector<8x128xf32>
    %124 = arith.mulf %98, %99 : f32
    %125 = vector.broadcast %124 : f32 to vector<8x128xf32>
    %126 = arith.addf %125, %54 : vector<8x128xf32>
    %127 = arith.subf %126, %123 : vector<8x128xf32>
    %cst_33 = arith.constant 5.000000e-01 : f32
    %128 = arith.cmpf ogt, %100, %cst_33 : f32
    %cst_34 = arith.constant 5.000000e-01 : f32
    %129 = vector.broadcast %cst_34 : f32 to vector<8x128xf32>
    %130 = arith.mulf %129, %127 : vector<8x128xf32>
    %131 = arith.cmpf ogt, %123, %130 : vector<8x128xf32>
    %132 = vector.broadcast %128 : i1 to vector<8x128xi1>
    %133 = arith.andi %132, %131 : vector<8x128xi1>
    %134 = arith.andi %56, %133 : vector<8x128xi1>
    %135 = arith.ori %95, %134 : vector<8x128xi1>
    %cst_35 = arith.constant 1.000000e+00 : f32
    %136 = vector.broadcast %cst_35 : f32 to vector<8x128xf32>
    %137 = arith.cmpf oeq, %17, %136 : vector<8x128xf32>
    %c10 = arith.constant 10 : index
    %138 = memref.load %arg5[%c10] : memref<20xf32, #tpu.memory_space<smem>>
    %c11 = arith.constant 11 : index
    %139 = memref.load %arg5[%c11] : memref<20xf32, #tpu.memory_space<smem>>
    %c12 = arith.constant 12 : index
    %140 = memref.load %arg5[%c12] : memref<20xf32, #tpu.memory_space<smem>>
    %c13 = arith.constant 13 : index
    %141 = memref.load %arg5[%c13] : memref<20xf32, #tpu.memory_space<smem>>
    %c14 = arith.constant 14 : index
    %142 = memref.load %arg5[%c14] : memref<20xf32, #tpu.memory_space<smem>>
    %cst_36 = arith.constant 5.000000e-01 : f32
    %143 = arith.mulf %140, %cst_36 : f32
    %144 = arith.subf %138, %143 : f32
    %cst_37 = arith.constant 5.000000e-01 : f32
    %145 = arith.mulf %140, %cst_37 : f32
    %146 = arith.addf %138, %145 : f32
    %cst_38 = arith.constant 5.000000e-01 : f32
    %147 = arith.mulf %141, %cst_38 : f32
    %148 = arith.subf %139, %147 : f32
    %cst_39 = arith.constant 5.000000e-01 : f32
    %149 = arith.mulf %141, %cst_39 : f32
    %150 = arith.addf %139, %149 : f32
    %151 = vector.broadcast %146 : f32 to vector<8x128xf32>
    %152 = arith.minimumf %151, %47 : vector<8x128xf32>
    %153 = vector.broadcast %144 : f32 to vector<8x128xf32>
    %154 = arith.maximumf %153, %44 : vector<8x128xf32>
    %155 = arith.subf %152, %154 : vector<8x128xf32>
    %cst_40 = arith.constant 0.000000e+00 : f32
    %156 = vector.broadcast %cst_40 : f32 to vector<8x128xf32>
    %157 = arith.maximumf %155, %156 : vector<8x128xf32>
    %158 = vector.broadcast %150 : f32 to vector<8x128xf32>
    %159 = arith.minimumf %158, %53 : vector<8x128xf32>
    %160 = vector.broadcast %148 : f32 to vector<8x128xf32>
    %161 = arith.maximumf %160, %50 : vector<8x128xf32>
    %162 = arith.subf %159, %161 : vector<8x128xf32>
    %cst_41 = arith.constant 0.000000e+00 : f32
    %163 = vector.broadcast %cst_41 : f32 to vector<8x128xf32>
    %164 = arith.maximumf %162, %163 : vector<8x128xf32>
    %165 = arith.mulf %157, %164 : vector<8x128xf32>
    %166 = arith.mulf %140, %141 : f32
    %167 = vector.broadcast %166 : f32 to vector<8x128xf32>
    %168 = arith.addf %167, %54 : vector<8x128xf32>
    %169 = arith.subf %168, %165 : vector<8x128xf32>
    %cst_42 = arith.constant 5.000000e-01 : f32
    %170 = arith.cmpf ogt, %142, %cst_42 : f32
    %cst_43 = arith.constant 5.000000e-01 : f32
    %171 = vector.broadcast %cst_43 : f32 to vector<8x128xf32>
    %172 = arith.mulf %171, %169 : vector<8x128xf32>
    %173 = arith.cmpf ogt, %165, %172 : vector<8x128xf32>
    %174 = vector.broadcast %170 : i1 to vector<8x128xi1>
    %175 = arith.andi %174, %173 : vector<8x128xi1>
    %176 = arith.andi %137, %175 : vector<8x128xi1>
    %177 = arith.ori %135, %176 : vector<8x128xi1>
    %c15 = arith.constant 15 : index
    %178 = memref.load %arg5[%c15] : memref<20xf32, #tpu.memory_space<smem>>
    %c16 = arith.constant 16 : index
    %179 = memref.load %arg5[%c16] : memref<20xf32, #tpu.memory_space<smem>>
    %c17 = arith.constant 17 : index
    %180 = memref.load %arg5[%c17] : memref<20xf32, #tpu.memory_space<smem>>
    %c18 = arith.constant 18 : index
    %181 = memref.load %arg5[%c18] : memref<20xf32, #tpu.memory_space<smem>>
    %c19 = arith.constant 19 : index
    %182 = memref.load %arg5[%c19] : memref<20xf32, #tpu.memory_space<smem>>
    %cst_44 = arith.constant 5.000000e-01 : f32
    %183 = arith.mulf %180, %cst_44 : f32
    %184 = arith.subf %178, %183 : f32
    %cst_45 = arith.constant 5.000000e-01 : f32
    %185 = arith.mulf %180, %cst_45 : f32
    %186 = arith.addf %178, %185 : f32
    %cst_46 = arith.constant 5.000000e-01 : f32
    %187 = arith.mulf %181, %cst_46 : f32
    %188 = arith.subf %179, %187 : f32
    %cst_47 = arith.constant 5.000000e-01 : f32
    %189 = arith.mulf %181, %cst_47 : f32
    %190 = arith.addf %179, %189 : f32
    %191 = vector.broadcast %186 : f32 to vector<8x128xf32>
    %192 = arith.minimumf %191, %47 : vector<8x128xf32>
    %193 = vector.broadcast %184 : f32 to vector<8x128xf32>
    %194 = arith.maximumf %193, %44 : vector<8x128xf32>
    %195 = arith.subf %192, %194 : vector<8x128xf32>
    %cst_48 = arith.constant 0.000000e+00 : f32
    %196 = vector.broadcast %cst_48 : f32 to vector<8x128xf32>
    %197 = arith.maximumf %195, %196 : vector<8x128xf32>
    %198 = vector.broadcast %190 : f32 to vector<8x128xf32>
    %199 = arith.minimumf %198, %53 : vector<8x128xf32>
    %200 = vector.broadcast %188 : f32 to vector<8x128xf32>
    %201 = arith.maximumf %200, %50 : vector<8x128xf32>
    %202 = arith.subf %199, %201 : vector<8x128xf32>
    %cst_49 = arith.constant 0.000000e+00 : f32
    %203 = vector.broadcast %cst_49 : f32 to vector<8x128xf32>
    %204 = arith.maximumf %202, %203 : vector<8x128xf32>
    %205 = arith.mulf %197, %204 : vector<8x128xf32>
    %206 = arith.mulf %180, %181 : f32
    %207 = vector.broadcast %206 : f32 to vector<8x128xf32>
    %208 = arith.addf %207, %54 : vector<8x128xf32>
    %209 = arith.subf %208, %205 : vector<8x128xf32>
    %cst_50 = arith.constant 5.000000e-01 : f32
    %210 = arith.cmpf ogt, %182, %cst_50 : f32
    %cst_51 = arith.constant 5.000000e-01 : f32
    %211 = vector.broadcast %cst_51 : f32 to vector<8x128xf32>
    %212 = arith.mulf %211, %209 : vector<8x128xf32>
    %213 = arith.cmpf ogt, %205, %212 : vector<8x128xf32>
    %214 = vector.broadcast %210 : i1 to vector<8x128xi1>
    %215 = arith.andi %214, %213 : vector<8x128xi1>
    %216 = arith.andi %137, %215 : vector<8x128xi1>
    %217 = arith.ori %177, %216 : vector<8x128xi1>
    %cst_52 = arith.constant 0.000000e+00 : f32
    %218 = vector.broadcast %cst_52 : f32 to vector<8x128xf32>
    %219 = arith.select %217, %218, %7 : vector<8x128xi1>, vector<8x128xf32>
    %220 = vector.extract_strided_slice %4 {offsets = [4, 0, 0], sizes = [1, 8, 128], strides = [1, 1, 1]} : vector<8x8x128xf32> to vector<1x8x128xf32>
    %221 = vector.shape_cast %220 : vector<1x8x128xf32> to vector<8x128xf32>
    %cst_53 = arith.constant 1.000000e+00 : f32
    %222 = vector.broadcast %cst_53 : f32 to vector<8x128xf32>
    %223 = arith.cmpf oeq, %221, %222 : vector<8x128xf32>
    %224 = arith.extui %223 : vector<8x128xi1> to vector<8x128xi32>
    %225 = arith.sitofp %224 : vector<8x128xi32> to vector<8x128xf32>
    %226 = vector.extract_strided_slice %4 {offsets = [0, 0, 0], sizes = [1, 8, 128], strides = [1, 1, 1]} : vector<8x8x128xf32> to vector<1x8x128xf32>
    %227 = vector.shape_cast %226 : vector<1x8x128xf32> to vector<8x128xf32>
    %228 = vector.extract_strided_slice %4 {offsets = [1, 0, 0], sizes = [1, 8, 128], strides = [1, 1, 1]} : vector<8x8x128xf32> to vector<1x8x128xf32>
    %229 = vector.shape_cast %228 : vector<1x8x128xf32> to vector<8x128xf32>
    %230 = vector.extract_strided_slice %4 {offsets = [2, 0, 0], sizes = [1, 8, 128], strides = [1, 1, 1]} : vector<8x8x128xf32> to vector<1x8x128xf32>
    %231 = vector.shape_cast %230 : vector<1x8x128xf32> to vector<8x128xf32>
    %232 = vector.extract_strided_slice %4 {offsets = [3, 0, 0], sizes = [1, 8, 128], strides = [1, 1, 1]} : vector<8x8x128xf32> to vector<1x8x128xf32>
    %233 = vector.shape_cast %232 : vector<1x8x128xf32> to vector<8x128xf32>
    %cst_54 = arith.constant 5.000000e-01 : f32
    %234 = vector.broadcast %cst_54 : f32 to vector<8x128xf32>
    %235 = arith.mulf %231, %234 : vector<8x128xf32>
    %236 = arith.subf %227, %235 : vector<8x128xf32>
    %cst_55 = arith.constant 5.000000e-01 : f32
    %237 = vector.broadcast %cst_55 : f32 to vector<8x128xf32>
    %238 = arith.mulf %231, %237 : vector<8x128xf32>
    %239 = arith.addf %227, %238 : vector<8x128xf32>
    %cst_56 = arith.constant 5.000000e-01 : f32
    %240 = vector.broadcast %cst_56 : f32 to vector<8x128xf32>
    %241 = arith.mulf %233, %240 : vector<8x128xf32>
    %242 = arith.subf %229, %241 : vector<8x128xf32>
    %cst_57 = arith.constant 5.000000e-01 : f32
    %243 = vector.broadcast %cst_57 : f32 to vector<8x128xf32>
    %244 = arith.mulf %233, %243 : vector<8x128xf32>
    %245 = arith.addf %229, %244 : vector<8x128xf32>
    %246 = arith.minimumf %47, %239 : vector<8x128xf32>
    %247 = arith.maximumf %44, %236 : vector<8x128xf32>
    %248 = arith.subf %246, %247 : vector<8x128xf32>
    %cst_58 = arith.constant 0.000000e+00 : f32
    %249 = vector.broadcast %cst_58 : f32 to vector<8x128xf32>
    %250 = arith.maximumf %248, %249 : vector<8x128xf32>
    %251 = arith.minimumf %53, %245 : vector<8x128xf32>
    %252 = arith.maximumf %50, %242 : vector<8x128xf32>
    %253 = arith.subf %251, %252 : vector<8x128xf32>
    %cst_59 = arith.constant 0.000000e+00 : f32
    %254 = vector.broadcast %cst_59 : f32 to vector<8x128xf32>
    %255 = arith.maximumf %253, %254 : vector<8x128xf32>
    %256 = arith.mulf %250, %255 : vector<8x128xf32>
    %257 = arith.mulf %231, %233 : vector<8x128xf32>
    %258 = arith.addf %54, %257 : vector<8x128xf32>
    %259 = arith.subf %258, %256 : vector<8x128xf32>
    %260 = arith.divf %256, %259 : vector<8x128xf32>
    %261 = arith.maximumf %47, %239 : vector<8x128xf32>
    %262 = arith.minimumf %44, %236 : vector<8x128xf32>
    %263 = arith.subf %261, %262 : vector<8x128xf32>
    %cst_60 = arith.constant 0.000000e+00 : f32
    %264 = vector.broadcast %cst_60 : f32 to vector<8x128xf32>
    %265 = arith.maximumf %263, %264 : vector<8x128xf32>
    %266 = arith.maximumf %53, %245 : vector<8x128xf32>
    %267 = arith.minimumf %50, %242 : vector<8x128xf32>
    %268 = arith.subf %266, %267 : vector<8x128xf32>
    %cst_61 = arith.constant 0.000000e+00 : f32
    %269 = vector.broadcast %cst_61 : f32 to vector<8x128xf32>
    %270 = arith.maximumf %268, %269 : vector<8x128xf32>
    %271 = arith.mulf %265, %270 : vector<8x128xf32>
    %272 = arith.subf %271, %259 : vector<8x128xf32>
    %273 = arith.divf %272, %271 : vector<8x128xf32>
    %274 = arith.subf %260, %273 : vector<8x128xf32>
    %275 = vector.extract_strided_slice %3 {offsets = [5, 0, 0], sizes = [1, 8, 128], strides = [1, 1, 1]} : vector<8x8x128xf32> to vector<1x8x128xf32>
    %276 = vector.shape_cast %275 : vector<1x8x128xf32> to vector<8x128xf32>
    %277 = vector.extract_strided_slice %4 {offsets = [5, 0, 0], sizes = [1, 8, 128], strides = [1, 1, 1]} : vector<8x8x128xf32> to vector<1x8x128xf32>
    %278 = vector.shape_cast %277 : vector<1x8x128xf32> to vector<8x128xf32>
    %cst_62 = arith.constant 0.000000e+00 : f32
    %279 = vector.broadcast %cst_62 : f32 to vector<8x128xf32>
    %280 = arith.maximumf %276, %279 : vector<8x128xf32>
    %281 = arith.mulf %276, %278 : vector<8x128xf32>
    %282 = arith.subf %280, %281 : vector<8x128xf32>
    %283 = math.absf %276 : vector<8x128xf32>
    %cst_63 = arith.constant 0.000000e+00 : f32
    %284 = vector.broadcast %cst_63 : f32 to vector<8x128xf32>
    %285 = arith.subf %284, %283 : vector<8x128xf32>
    %286 = math.exp %285 : vector<8x128xf32>
    %cst_64 = arith.constant 1.000000e+00 : f32
    %287 = vector.broadcast %cst_64 : f32 to vector<8x128xf32>
    %288 = arith.addf %287, %286 : vector<8x128xf32>
    %289 = math.log %288 : vector<8x128xf32>
    %290 = arith.addf %282, %289 : vector<8x128xf32>
    %291 = vector.extract_strided_slice %3 {offsets = [6, 0, 0], sizes = [1, 8, 128], strides = [1, 1, 1]} : vector<8x8x128xf32> to vector<1x8x128xf32>
    %292 = vector.shape_cast %291 : vector<1x8x128xf32> to vector<8x128xf32>
    %293 = vector.extract_strided_slice %4 {offsets = [6, 0, 0], sizes = [1, 8, 128], strides = [1, 1, 1]} : vector<8x8x128xf32> to vector<1x8x128xf32>
    %294 = vector.shape_cast %293 : vector<1x8x128xf32> to vector<8x128xf32>
    %cst_65 = arith.constant 0.000000e+00 : f32
    %295 = vector.broadcast %cst_65 : f32 to vector<8x128xf32>
    %296 = arith.maximumf %292, %295 : vector<8x128xf32>
    %297 = arith.mulf %292, %294 : vector<8x128xf32>
    %298 = arith.subf %296, %297 : vector<8x128xf32>
    %299 = math.absf %292 : vector<8x128xf32>
    %cst_66 = arith.constant 0.000000e+00 : f32
    %300 = vector.broadcast %cst_66 : f32 to vector<8x128xf32>
    %301 = arith.subf %300, %299 : vector<8x128xf32>
    %302 = math.exp %301 : vector<8x128xf32>
    %cst_67 = arith.constant 1.000000e+00 : f32
    %303 = vector.broadcast %cst_67 : f32 to vector<8x128xf32>
    %304 = arith.addf %303, %302 : vector<8x128xf32>
    %305 = math.log %304 : vector<8x128xf32>
    %306 = arith.addf %298, %305 : vector<8x128xf32>
    %307 = arith.addf %290, %306 : vector<8x128xf32>
    %308 = vector.extract_strided_slice %3 {offsets = [7, 0, 0], sizes = [1, 8, 128], strides = [1, 1, 1]} : vector<8x8x128xf32> to vector<1x8x128xf32>
    %309 = vector.shape_cast %308 : vector<1x8x128xf32> to vector<8x128xf32>
    %310 = vector.extract_strided_slice %4 {offsets = [7, 0, 0], sizes = [1, 8, 128], strides = [1, 1, 1]} : vector<8x8x128xf32> to vector<1x8x128xf32>
    %311 = vector.shape_cast %310 : vector<1x8x128xf32> to vector<8x128xf32>
    %cst_68 = arith.constant 0.000000e+00 : f32
    %312 = vector.broadcast %cst_68 : f32 to vector<8x128xf32>
    %313 = arith.maximumf %309, %312 : vector<8x128xf32>
    %314 = arith.mulf %309, %311 : vector<8x128xf32>
    %315 = arith.subf %313, %314 : vector<8x128xf32>
    %316 = math.absf %309 : vector<8x128xf32>
    %cst_69 = arith.constant 0.000000e+00 : f32
    %317 = vector.broadcast %cst_69 : f32 to vector<8x128xf32>
    %318 = arith.subf %317, %316 : vector<8x128xf32>
    %319 = math.exp %318 : vector<8x128xf32>
    %cst_70 = arith.constant 1.000000e+00 : f32
    %320 = vector.broadcast %cst_70 : f32 to vector<8x128xf32>
    %321 = arith.addf %320, %319 : vector<8x128xf32>
    %322 = math.log %321 : vector<8x128xf32>
    %323 = arith.addf %315, %322 : vector<8x128xf32>
    %324 = arith.addf %307, %323 : vector<8x128xf32>
    %325 = vector.extract_strided_slice %3 {offsets = [4, 0, 0], sizes = [1, 8, 128], strides = [1, 1, 1]} : vector<8x8x128xf32> to vector<1x8x128xf32>
    %326 = vector.shape_cast %325 : vector<1x8x128xf32> to vector<8x128xf32>
    %cst_71 = arith.constant 0.000000e+00 : f32
    %327 = vector.broadcast %cst_71 : f32 to vector<8x128xf32>
    %328 = arith.maximumf %326, %327 : vector<8x128xf32>
    %329 = arith.mulf %326, %225 : vector<8x128xf32>
    %330 = arith.subf %328, %329 : vector<8x128xf32>
    %331 = math.absf %326 : vector<8x128xf32>
    %cst_72 = arith.constant 0.000000e+00 : f32
    %332 = vector.broadcast %cst_72 : f32 to vector<8x128xf32>
    %333 = arith.subf %332, %331 : vector<8x128xf32>
    %334 = math.exp %333 : vector<8x128xf32>
    %cst_73 = arith.constant 1.000000e+00 : f32
    %335 = vector.broadcast %cst_73 : f32 to vector<8x128xf32>
    %336 = arith.addf %335, %334 : vector<8x128xf32>
    %337 = math.log %336 : vector<8x128xf32>
    %338 = arith.addf %330, %337 : vector<8x128xf32>
    %cst_74 = arith.constant 5.000000e-01 : f32
    %339 = vector.broadcast %cst_74 : f32 to vector<8x128xf32>
    %340 = arith.cmpf ogt, %219, %339 : vector<8x128xf32>
    %341 = arith.ori %340, %223 : vector<8x128xi1>
    %342 = arith.extui %341 : vector<8x128xi1> to vector<8x128xi32>
    %343 = arith.sitofp %342 : vector<8x128xi32> to vector<8x128xf32>
    %cst_75 = arith.constant 1.000000e+00 : f32
    %344 = vector.broadcast %cst_75 : f32 to vector<8x128xf32>
    %345 = arith.subf %344, %274 : vector<8x128xf32>
    %cst_76 = arith.constant 0.000000e+00 : f32
    %346 = vector.broadcast %cst_76 : f32 to vector<8x128xf32>
    %347 = arith.select %223, %345, %346 : vector<8x128xi1>, vector<8x128xf32>
    %cst_77 = arith.constant dense<0.000000e+00> : vector<128xf32>
    %348 = vector.multi_reduction <add>, %347, %cst_77 [0] : vector<8x128xf32> to vector<128xf32>
    %349 = vector.shape_cast %348 : vector<128xf32> to vector<1x128xf32>
    %cst_78 = arith.constant dense<0.000000e+00> : vector<128xf32>
    %350 = vector.multi_reduction <add>, %225, %cst_78 [0] : vector<8x128xf32> to vector<128xf32>
    %351 = vector.shape_cast %350 : vector<128xf32> to vector<1x128xf32>
    %cst_79 = arith.constant 0.000000e+00 : f32
    %352 = vector.broadcast %cst_79 : f32 to vector<8x128xf32>
    %353 = arith.select %223, %324, %352 : vector<8x128xi1>, vector<8x128xf32>
    %cst_80 = arith.constant dense<0.000000e+00> : vector<128xf32>
    %354 = vector.multi_reduction <add>, %353, %cst_80 [0] : vector<8x128xf32> to vector<128xf32>
    %355 = vector.shape_cast %354 : vector<128xf32> to vector<1x128xf32>
    %cst_81 = arith.constant 0.000000e+00 : f32
    %356 = vector.broadcast %cst_81 : f32 to vector<8x128xf32>
    %357 = arith.select %341, %338, %356 : vector<8x128xi1>, vector<8x128xf32>
    %cst_82 = arith.constant dense<0.000000e+00> : vector<128xf32>
    %358 = vector.multi_reduction <add>, %357, %cst_82 [0] : vector<8x128xf32> to vector<128xf32>
    %359 = vector.shape_cast %358 : vector<128xf32> to vector<1x128xf32>
    %cst_83 = arith.constant dense<0.000000e+00> : vector<128xf32>
    %360 = vector.multi_reduction <add>, %343, %cst_83 [0] : vector<8x128xf32> to vector<128xf32>
    %361 = vector.shape_cast %360 : vector<128xf32> to vector<1x128xf32>
    %cst_84 = arith.constant 0.000000e+00 : f32
    %362 = vector.broadcast %cst_84 : f32 to vector<3x128xf32>
    %c0_85 = arith.constant 0 : index
    %c0_86 = arith.constant 0 : index
    %363 = vector.load %arg7[%c0_85, %c0_86] : memref<8x128xf32, #tpu.memory_space<vmem>>, vector<8x128xf32>
    %364 = tpu.concatenate %349, %351, %355, %359, %361, %362 in 0 : vector<1x128xf32>, vector<1x128xf32>, vector<1x128xf32>, vector<1x128xf32>, vector<1x128xf32>, vector<3x128xf32> -> vector<8x128xf32>
    %365 = arith.addf %363, %364 : vector<8x128xf32>
    %c0_87 = arith.constant 0 : index
    %c0_88 = arith.constant 0 : index
    %366 = vector.load %arg7[%c0_87, %c0_88] : memref<8x128xf32, #tpu.memory_space<vmem>>, vector<8x128xf32>
    tpu.vector_store %arg7[%c0_87, %c0_88], %365 {strides = array<i32>} : memref<8x128xf32, #tpu.memory_space<vmem>>, vector<8x128xf32>,
    %c1_i32 = arith.constant 1 : i32
    %367 = arith.cmpi eq, %arg0, %c1_i32 : i32
    %368 = arith.extui %367 : i1 to i32
    %c0_i32_89 = arith.constant 0 : i32
    %369 = arith.cmpi ne, %368, %c0_i32_89 : i32
    scf.if %369 {
      %c0_90 = arith.constant 0 : index
      %c0_91 = arith.constant 0 : index
      %370 = vector.load %arg7[%c0_90, %c0_91] : memref<8x128xf32, #tpu.memory_space<vmem>>, vector<8x128xf32>
      %cst_92 = arith.constant dense<0.000000e+00> : vector<8xf32>
      %371 = vector.multi_reduction <add>, %370, %cst_92 [1] : vector<8x128xf32> to vector<8xf32>
      %372 = vector.shape_cast %371 : vector<8xf32> to vector<8x1xf32>
      %373 = vector.extract_strided_slice %372 {offsets = [0, 0], sizes = [1, 1], strides = [1, 1]} : vector<8x1xf32> to vector<1x1xf32>
      %374 = vector.extract_strided_slice %372 {offsets = [1, 0], sizes = [1, 1], strides = [1, 1]} : vector<8x1xf32> to vector<1x1xf32>
      %375 = vector.extract_strided_slice %372 {offsets = [2, 0], sizes = [1, 1], strides = [1, 1]} : vector<8x1xf32> to vector<1x1xf32>
      %376 = vector.extract_strided_slice %372 {offsets = [3, 0], sizes = [1, 1], strides = [1, 1]} : vector<8x1xf32> to vector<1x1xf32>
      %377 = vector.extract_strided_slice %372 {offsets = [4, 0], sizes = [1, 1], strides = [1, 1]} : vector<8x1xf32> to vector<1x1xf32>
      %cst_93 = arith.constant 1.000000e+00 : f32
      %378 = vector.broadcast %cst_93 : f32 to vector<1x1xf32>
      %379 = arith.maximumf %374, %378 : vector<1x1xf32>
      %380 = arith.divf %373, %379 : vector<1x1xf32>
      %cst_94 = arith.constant 3.000000e+00 : f32
      %381 = vector.broadcast %cst_94 : f32 to vector<1x1xf32>
      %382 = arith.mulf %379, %381 : vector<1x1xf32>
      %383 = arith.divf %375, %382 : vector<1x1xf32>
      %cst_95 = arith.constant 0.000000e+00 : f32
      %384 = vector.broadcast %cst_95 : f32 to vector<1x1xf32>
      %385 = arith.cmpf ogt, %374, %384 : vector<1x1xf32>
      %cst_96 = arith.constant 5.000000e-02 : f32
      %386 = vector.broadcast %cst_96 : f32 to vector<1x1xf32>
      %387 = arith.mulf %380, %386 : vector<1x1xf32>
      %cst_97 = arith.constant 3.750000e-02 : f32
      %388 = vector.broadcast %cst_97 : f32 to vector<1x1xf32>
      %389 = arith.mulf %383, %388 : vector<1x1xf32>
      %390 = arith.addf %387, %389 : vector<1x1xf32>
      %cst_98 = arith.constant 0.000000e+00 : f32
      %391 = vector.broadcast %cst_98 : f32 to vector<1x1xf32>
      %392 = arith.select %385, %390, %391 : vector<1x1xi1>, vector<1x1xf32>
      %cst_99 = arith.constant 1.000000e+00 : f32
      %393 = vector.broadcast %cst_99 : f32 to vector<1x1xf32>
      %394 = arith.maximumf %377, %393 : vector<1x1xf32>
      %395 = arith.divf %376, %394 : vector<1x1xf32>
      %cst_100 = arith.constant 0.118343197 : f32
      %396 = vector.broadcast %cst_100 : f32 to vector<1x1xf32>
      %397 = arith.mulf %395, %396 : vector<1x1xf32>
      %398 = arith.addf %392, %397 : vector<1x1xf32>
      %c0_101 = arith.constant 0 : index
      %c0_102 = arith.constant 0 : index
      %399 = vector.load %arg6[%c0_101, %c0_102] : memref<1x1xf32, #tpu.memory_space<vmem>>, vector<1x1xf32>
      tpu.vector_store %arg6[%c0_101, %c0_102], %398 {strides = array<i32>} : memref<1x1xf32, #tpu.memory_space<vmem>>, vector<1x1xf32>,
    } else {
    }
    return
  }
  func.func @transform_0(%arg0: i32) -> (i32, i32, i32) {
    %c0_i32 = arith.constant 0 : i32
    %c0_i32_0 = arith.constant 0 : i32
    %c0_i32_1 = arith.constant 0 : i32
    return %c0_i32, %arg0, %c0_i32_0 : i32, i32, i32
  }
  func.func @transform_1(%arg0: i32) -> (i32, i32, i32) {
    %c0_i32 = arith.constant 0 : i32
    %c0_i32_0 = arith.constant 0 : i32
    %c0_i32_1 = arith.constant 0 : i32
    return %c0_i32, %arg0, %c0_i32_0 : i32, i32, i32
  }
  func.func @transform_2(%arg0: i32) -> (i32, i32, i32) {
    %c0_i32 = arith.constant 0 : i32
    %c0_i32_0 = arith.constant 0 : i32
    %c0_i32_1 = arith.constant 0 : i32
    return %c0_i32, %arg0, %c0_i32_0 : i32, i32, i32
  }
  func.func @transform_3(%arg0: i32) -> (i32, i32, i32) {
    %c0_i32 = arith.constant 0 : i32
    %c0_i32_0 = arith.constant 0 : i32
    %c0_i32_1 = arith.constant 0 : i32
    return %c0_i32, %arg0, %c0_i32_0 : i32, i32, i32
  }
  func.func @transform_4(%arg0: i32) -> i32 {
    %c0_i32 = arith.constant 0 : i32
    %c0_i32_0 = arith.constant 0 : i32
    return %c0_i32 : i32
  }
  func.func @transform_5(%arg0: i32) -> (i32, i32) {
    %c0_i32 = arith.constant 0 : i32
    %c0_i32_0 = arith.constant 0 : i32
    %c0_i32_1 = arith.constant 0 : i32
    return %c0_i32, %c0_i32_0 : i32, i32
  }
}

</mosaic_0001>

<bundles_post_ra>
// kernel: tpu_custom_call.1
= control target key start
LH: loop header
LB: loop body
LE: loop exit
PB: predicated region body
PF: predicated region fallthrough
CT: control target
= control target key end

     0   :  { %s1892_s0 = inlined_call_operand.hbm [shape: f32[8,16,128], index: 0, kind: input, shape index: {}]   ;;  %s1893_s1 = inlined_call_operand.hbm [shape: f32[8,16,128], index: 1, kind: input, shape index: {}]   ;;  %s1894_s2 = inlined_call_operand.hbm [shape: f32[5,16,128], index: 2, kind: input, shape index: {}]   ;;  %s1895_s3 = inlined_call_operand.hbm [shape: f32[1,16,128], index: 3, kind: input, shape index: {}]   ;;  %s1896_s4 = inlined_call_operand.vmem [shape: f32[20], index: 4, kind: input, shape index: {}]   ;;  %s1897_s5 = inlined_call_operand.hbm [shape: f32[1,1], index: 5, kind: output, shape index: {}]  }
   0x1   :  { %1912 = sst [smem:[#allocation23_spill]] %s1892_s0 }
   0x2   :  { %1913 = sst [smem:[#allocation24_spill]] %s1893_s1 }
   0x3   :  { %1914 = sst [smem:[#allocation25_spill]] %s1894_s2 }
   0x4   :  { %1915 = sst [smem:[#allocation26_spill]] %s1895_s3 }
   0x5   :  { %1916 = sst [smem:[#allocation27_spill]] %s1896_s4 }
   0x6   :  { %10 = vsyncpa [#allocation4], 0 }
   0x7   :  { %12 = vsyncpa [#allocation4 + $0x1], 0 }
   0x8   :  { %13 = vsyncpa [#allocation8], 0 }
   0x9   :  { %15 = vsyncpa [#allocation8 + $0x1], 0 }
   0xa   :  { %16 = vsyncpa [#allocation11], 0 }
   0xb   :  { %18 = vsyncpa [#allocation11 + $0x1], 0 }
   0xc   :  { %19 = vsyncpa [#allocation6], 0 }
   0xd   :  { %20 = vsyncpa [#allocation5], 0  ;;  %s1279_s18 = smov 0   ;;  %s1281_s19 = smov 0  }
   0xe   :  { %s1283_s20 = smov 0   ;;  %s1285_s21 = smov 0  }
   0xf LB: > { %1917 = sst [smem:[#allocation19_spill]] %s1228_s19  ;;  %s1300_s22 = sadd.s32 1, %s1236_s21   ;;  %s1236_s21 = sphi %s1285_s21, %s1955_s21   ;;  %s1232_s20 = sphi %s1283_s20, %s1958_s20   ;;  %s1228_s19 = sphi %s1281_s19, %s1957_s19   ;;  %s1224_s18 = sphi %s1279_s18, %s1956_s18  }
  0x10   : > { %1918 = sst [smem:[#allocation20_spill]] %s1232_s20  ;;  %s33_s23 = sadd.s32 1, %s1232_s20 }
  0x11   : > { %1919 = sst [smem:[#allocation21_spill]] %s1300_s22  ;;  %s30_s24 = ssub.s32 %s1236_s21, %s1300_s22 }
  0x12   : > { %p40_p0 = scmp.ne.s32.totalorder %s1232_s20, %s1228_s19  ;;  %p31_p1 = scmp.eq.s32.totalorder %s30_s24, 0 }
  0x13   : > { %p41_p2 = scmp.eq.s32.totalorder %s1236_s21, 0  ;;  %p946_p3 = scmp.lt.s32.totalorder %s1236_s21, 2 }
  0x14   : > { %s1310_s25 = scalar_select %p31_p1, %s1232_s20, %s33_s23  }
  0x15   : > { %p42_p4 = por %p41_p2, %p40_p0  ;;  %s1313_s26 = sand.u32 1, %s1232_s20  }
  0x16   : > { %1920 = sst [smem:[#allocation22_spill]] %s1310_s25  ;;  %s869_s27 = sshll.u32 %s1313_s26, 6 }
  0x17   : > { %s1317_s28 = sshll.u32 %s1236_s21, 7  ;;  %p1319_p5 = pnand %p946_p3, %p42_p4 }
  0x18   : > { %s221_s30 = sand.u32 1, %s1236_s21   ;;  %s1922_s1 = sld [smem:[#allocation24_spill]] }
  0x19   : > { %s1921_s29 = scalar_select %p1319_p5, 1, 0 }
  0x1a   : > { %s225_s9 = scalar_lea.vmem [#allocation7], %s869_s27  ;;  %s1334_s11 = scalar_lea.sflag [#allocation8], %s221_s30 }
  0x1b   : > { %s231_s10 = sshll.u32 %s225_s9, 4  ;;  %p1340_p7 = pneg %p1319_p5  ;;  %s1332_s10 = int_to_ptr.vmem [resolvable:$true] %s231_s10 }
  0x1e   : > { %s1328_s8 = scalar_lea.hbm %s1922_s1, %s1317_s28  ;;  %s1030_s16 = scalar_lea.hbm %s1922_s1, 2048 }
  0x1f   : > { %s1025_s12 = scalar_lea.hbm %s1328_s8, 1024  ;;  %p1031_p10 = scmp.lt.u32.totalorder %s1328_s8, %s1922_s1 }
  0x20   : > { %p1026_p6 = scmp.ne.s32.totalorder %s1328_s8, %s1025_s12  ;;  %p1032_p11 = scmp.lt.u32.totalorder %s1030_s16, %s1025_s12 }
  0x21   : > { %p1034_p13 = scmp.lt.u32.totalorder %s1025_s12, %s1328_s8 }
  0x22   : > { %p1028_p8 = pnand %p1340_p7, %p1026_p6  ;;  %p1033_p12 = por %p1032_p11, %p1031_p10 }
  0x24   : > { %p1029_p9 = pneg %p1028_p8  ;;  %p1035_p0 = por %p1034_p13, %p1033_p12 }
  0x26   : > { %p1036_p1 = pnand %p1035_p0, %p1029_p9 }
  0x28   : > { %1039 = shalt.err (!%p1036_p1)
}
  0x29   : > { %s1040_s24 = scalar_lea.vmem %s1332_s10, 1024  ;;  %s1238_s30 = smov [#allocation7]  }
  0x2a   : > { %p1041_p2 = scmp.ne.s32.totalorder %s1332_s10, %s1040_s24  ;;  %s1045_s6 = sshll.u32 %s1238_s30, 4  ;;  %s1046_s6 = int_to_ptr.vmem [resolvable:$false] %s1045_s6 }
  0x2b   : > { %s1047_s7 = scalar_lea.vmem %s1046_s6, 2048  ;;  %p1048_p6 = scmp.lt.s32.totalorder %s1332_s10, %s1046_s6 }
  0x2c   : > { %p1043_p3 = pnand %p1041_p2, %p1340_p7  ;;  %p1049_p8 = scmp.lt.s32.totalorder %s1047_s7, %s1040_s24 }
  0x2e   : > { %p1044_p4 = pneg %p1043_p3  ;;  %p1050_p10 = por %p1049_p8, %p1048_p6 }
  0x30   : > { %p1051_p11 = pnand %p1050_p10, %p1044_p4 }
  0x32   : > { %1054 = shalt.err (!%p1051_p11)
}
  0x33   : > { %s1898_s9 = smov 256   ;;  %s1900_s12 = smov 128  }
  0x34   : > { %s1903_s14 = smov 8   ;;  %s1368_s15 = sadd.s32 4294967295, %s1236_s21  }
  0x35   : > { %938 = dma.hbm_to_vmem [thread:$0]  (!%p1319_p5), %s1328_s8, 1024, %s1332_s10, %s1334_s11, %s1898_s9, %s1900_s12, %s1903_s14  }
  0x36   : > { %p46_p9 = scmp.ne.s32.totalorder %s1228_s19, %s1224_s18  ;;  %p1902_p12 = scmp.eq.s32.totalorder %s1368_s15, 0 }
  0x37   : > { %p866_p13 = scmp.ge.s32.totalorder %s1236_s21, 1  ;;  %p177_p0 = scmp.lt.s32.totalorder %s1236_s21, 3 }
  0x38   : > { %p1377_p1 = por %p1902_p12, %p46_p9  ;;  %s1926_s4 = sld [smem:[#allocation27_spill]] }
  0x39   : > { %p1382_p3 = pnand %p866_p13, %p177_p0  ;;  %s1927_s0 = sld [smem:[#allocation23_spill]] }
  0x3a   : > { %s1924_s16 = scalar_select %p1377_p1, 1, 0 }
  0x3b   : > { %s1925_s8 = scalar_select %p1382_p3, 1, 0 }
  0x3c   : > { %p928_p4 = pneg %p1382_p3  ;;  %s205_s6 = scalar_lea.vmem [#allocation3], %s869_s27 }
  0x3d   : > { %s211_s7 = sshll.u32 %s205_s6, 4  ;;  %s1929_s2 = sld [smem:[#allocation25_spill]]  ;;  %s1405_s7 = int_to_ptr.vmem [resolvable:$true] %s211_s7 }
  0x3e   : > { %s190_s23 = sshll.u32 %s1926_s4, 4  ;;  %p1399_p6 = pnand %p928_p4, %p1902_p12  ;;  %s191_s23 = int_to_ptr.vmem [resolvable:$true] %s190_s23 }
  0x3f   : > { %s1395_s24 = scalar_lea.hbm %s1927_s0, %s1317_s28  ;;  %s1055_s18 = scalar_lea.vmem %s191_s23, 16 }
  0x40   : > { %p1056_p8 = scmp.ne.s32.totalorder %s191_s23, %s1055_s18  ;;  %p1057_p10 = pneg %p1399_p6 }
  0x41   : > { %p1063_p13 = scmp.lt.s32.totalorder %s191_s23, %s191_s23  ;;  %p1064_p0 = scmp.lt.s32.totalorder %s1055_s18, %s1055_s18 }
  0x42   : > { %p1058_p11 = pnand %p1057_p10, %p1056_p8 }
  0x43   : > { %s1412_s12 = scalar_lea.hbm %s1929_s2, %s1317_s28  ;;  %p1065_p4 = por %p1064_p0, %p1063_p13 }
  0x44   : > { %p1059_p9 = pneg %p1058_p11 }
  0x46   : > { %p1066_p2 = pnand %p1065_p4, %p1059_p9 }
  0x48   : > { %1069 = shalt.err (!%p1066_p2)
}
  0x49   : > { %s1242_s27 = smov [#allocation12]   ;;  %s202_s9 = scalar_lea.sflag [#allocation4], %s1313_s26 }
  0x4a   : > { %931 = dma.vmem_to_smem (!%p1399_p6), %s191_s23, 16, %s1242_s27, [#allocation6]  }
  0x4b   : > { %s1070_s21 = scalar_lea.hbm %s1395_s24, 1024  ;;  %s1075_s18 = scalar_lea.hbm %s1927_s0, 2048 }
  0x4c   : > { %p1071_p12 = scmp.ne.s32.totalorder %s1395_s24, %s1070_s21  ;;  %p1076_p2 = scmp.lt.u32.totalorder %s1395_s24, %s1927_s0 }
  0x4d   : > { %p1077_p11 = scmp.lt.u32.totalorder %s1075_s18, %s1070_s21  ;;  %p1079_p13 = scmp.lt.u32.totalorder %s1070_s21, %s1395_s24 }
  0x4e   : > { %p1073_p8 = pnand %p1071_p12, %p1340_p7 }
  0x4f   : > { %p1078_p9 = por %p1077_p11, %p1076_p2 }
  0x50   : > { %p1074_p10 = pneg %p1073_p8 }
  0x51   : > { %p1080_p0 = por %p1079_p13, %p1078_p9 }
  0x53   : > { %p1081_p4 = pnand %p1080_p0, %p1074_p10 }
  0x55   : > { %1084 = shalt.err (!%p1081_p4)
}
  0x56   : > { %s1085_s23 = scalar_lea.vmem %s1405_s7, 1024  ;;  %s1243_s30 = smov [#allocation3]  }
  0x57   : > { %p1086_p12 = scmp.ne.s32.totalorder %s1405_s7, %s1085_s23  ;;  %s1090_s27 = sshll.u32 %s1243_s30, 4  ;;  %s1091_s27 = int_to_ptr.vmem [resolvable:$false] %s1090_s27 }
  0x58   : > { %s1092_s14 = scalar_lea.vmem %s1091_s27, 2048  ;;  %p1093_p1 = scmp.lt.s32.totalorder %s1405_s7, %s1091_s27 }
  0x59   : > { %p1088_p6 = pnand %p1086_p12, %p1340_p7  ;;  %p1094_p3 = scmp.lt.s32.totalorder %s1092_s14, %s1085_s23 }
  0x5b   : > { %p1089_p8 = pneg %p1088_p6  ;;  %p1095_p2 = por %p1094_p3, %p1093_p1 }
  0x5d   : > { %p1096_p11 = pnand %p1095_p2, %p1089_p8 }
  0x5f   : > { %1099 = shalt.err (!%p1096_p11)
}
  0x60   : > { %s1930_s10 = smov 8   ;;  %s1931_s21 = smov 128  }
  0x61   : > { %s1932_s6 = smov 256   ;;  %s1933_s17 = smul.u32 40, %s1313_s26 }
  0x62   : > { %935 = dma.hbm_to_vmem [thread:$0]  (!%p1319_p5), %s1395_s24, 1024, %s1405_s7, %s202_s9, %s1932_s6, %s1931_s21, %s1930_s10  }
  0x63   : > { %s245_s18 = scalar_lea.vmem [#allocation9], %s1933_s17  ;;  %s874_s30 = sshll.u32 %s1313_s26, 3 }
  0x64   : > { %s251_s23 = sshll.u32 %s245_s18, 4  ;;  %s1100_s27 = scalar_lea.hbm %s1412_s12, 640  ;;  %s1448_s23 = int_to_ptr.vmem [resolvable:$true] %s251_s23 }
  0x65   : > { %p1101_p1 = scmp.ne.s32.totalorder %s1412_s12, %s1100_s27  ;;  %s1105_s1 = scalar_lea.hbm %s1929_s2, 1280 }
  0x66   : > { %p1106_p9 = scmp.lt.u32.totalorder %s1412_s12, %s1929_s2  ;;  %p1107_p13 = scmp.lt.u32.totalorder %s1105_s1, %s1100_s27 }
  0x67   : > { %p1103_p3 = pnand %p1101_p1, %p1340_p7  ;;  %p1109_p4 = scmp.lt.u32.totalorder %s1100_s27, %s1412_s12 }
  0x68   : > { %p1108_p0 = por %p1107_p13, %p1106_p9 }
  0x69   : > { %p1104_p10 = pneg %p1103_p3 }
  0x6a   : > { %p1110_p12 = por %p1109_p4, %p1108_p0 }
  0x6c   : > { %p1111_p6 = pnand %p1110_p12, %p1104_p10 }
  0x6e   : > { %1114 = shalt.err (!%p1111_p6)
}
  0x6f   : > { %s1115_s24 = scalar_lea.vmem %s1448_s23, 640  ;;  %s1244_s0 = smov [#allocation9]  }
  0x70   : > { %p1116_p8 = scmp.ne.s32.totalorder %s1448_s23, %s1115_s24  ;;  %s1120_s7 = sshll.u32 %s1244_s0, 4  ;;  %s1121_s7 = int_to_ptr.vmem [resolvable:$false] %s1120_s7 }
  0x71   : > { %s1122_s4 = scalar_lea.vmem %s1121_s7, 1280  ;;  %p1123_p1 = scmp.lt.s32.totalorder %s1448_s23, %s1121_s7 }
  0x72   : > { %p1118_p2 = pnand %p1116_p8, %p1340_p7  ;;  %p1124_p3 = scmp.lt.s32.totalorder %s1122_s4, %s1115_s24 }
  0x74   : > { %p1119_p11 = pneg %p1118_p2  ;;  %p1125_p9 = por %p1124_p3, %p1123_p1 }
  0x76   : > { %p1126_p13 = pnand %p1125_p9, %p1119_p11 }
  0x78   : > { %1129 = shalt.err (!%p1126_p13)
}
  0x79   : > { %941 = dma.hbm_to_vmem [thread:$0]  (!%p1319_p5), %s1412_s12, 640, %s1448_s23, %s1334_s11, %s1932_s6, %s1931_s21, %s1930_s10  }
  0x7a   : > { %s1934_s3 = sld [smem:[#allocation26_spill]]  ;;  %s265_s17 = scalar_lea.vmem [#allocation10], %s874_s30 }
  0x7b   : > { %s272_s18 = sshll.u32 %s265_s17, 4  ;;  %s262_s27 = scalar_lea.sflag [#allocation11], %s1313_s26  ;;  %s273_s18 = int_to_ptr.vmem [resolvable:$true] %s272_s18 }
  0x80   : > { %s1479_s9 = scalar_lea.hbm %s1934_s3, %s1317_s28  ;;  %s1135_s10 = scalar_lea.hbm %s1934_s3, 256 }
  0x81   : > { %s1130_s14 = scalar_lea.hbm %s1479_s9, 128  ;;  %p1136_p12 = scmp.lt.u32.totalorder %s1479_s9, %s1934_s3 }
  0x82   : > { %p1131_p10 = scmp.ne.s32.totalorder %s1479_s9, %s1130_s14  ;;  %p1137_p6 = scmp.lt.u32.totalorder %s1135_s10, %s1130_s14 }
  0x83   : > { %p1139_p2 = scmp.lt.u32.totalorder %s1130_s14, %s1479_s9 }
  0x84   : > { %p1133_p0 = pnand %p1131_p10, %p1340_p7  ;;  %p1138_p8 = por %p1137_p6, %p1136_p12 }
  0x86   : > { %p1134_p4 = pneg %p1133_p0  ;;  %p1140_p11 = por %p1139_p2, %p1138_p8 }
  0x88   : > { %p1141_p1 = pnand %p1140_p11, %p1134_p4 }
  0x8a   : > { %1144 = shalt.err (!%p1141_p1)
}
  0x8b   : > { %s1145_s26 = scalar_lea.vmem %s273_s18, 128  ;;  %s1245_s6 = smov [#allocation10]  }
  0x8c   : > { %p1146_p3 = scmp.ne.s32.totalorder %s273_s18, %s1145_s26  ;;  %s1150_s23 = sshll.u32 %s1245_s6, 4  ;;  %s1151_s23 = int_to_ptr.vmem [resolvable:$false] %s1150_s23 }
  0x8d   : > { %s1152_s30 = scalar_lea.vmem %s1151_s23, 256  ;;  %p1153_p10 = scmp.lt.s32.totalorder %s273_s18, %s1151_s23 }
  0x8e   : > { %p1148_p9 = pnand %p1146_p3, %p1340_p7  ;;  %p1154_p0 = scmp.lt.s32.totalorder %s1152_s30, %s1145_s26 }
  0x90   : > { %p1149_p13 = pneg %p1148_p9  ;;  %p1155_p5 = por %p1154_p0, %p1153_p10 }
  0x92   : > { %p1156_p6 = pnand %p1155_p5, %p1149_p13 }
  0x94   : > { %1159 = shalt.err (!%p1156_p6)
}
  0x95   : > { %p1935_p12 = scmp.ne.s32.totalorder %s1921_s29, 0  ;;  %p1936_p4 = scmp.ne.s32.totalorder %s1925_s8, 0 }
  0x96   : > { %s283_s13 = sand.u32 (!%p1936_p4), 1, %s1228_s19   ;;  %p1937_p7 = scmp.ne.s32.totalorder (!%p1936_p4), %s1924_s16, 0 }
  0x97   : > { %944 = dma.hbm_to_vmem [thread:$0]  (!%p1935_p12), %s1479_s9, 128, %s273_s18, %s262_s27  }
  0x98   : > { %281 = sbr.rel (%p1936_p4) target bundleno = 478 (0x1de), region = 40  ;;  %s877_s24 = sshll.u32 (!%p1936_p4), %s283_s13, 6 }
  0x99   : > { %s284_s0 = scalar_lea.sflag (!%p1936_p4), [#allocation4], %s283_s13  ;;  %s1504_s7 = scalar_lea.vmem (!%p1936_p4), [#allocation3], %s877_s24 }
  0x9f   : > { %1203 = dma.done.wait (%p1937_p7), %s284_s0, 1024  }
  0xa0   : > { %1205 = vsyncadd (%p1937_p7), %s284_s0, 4294966272  ;;  %s292_s29 = sand.u32 1, %s1368_s15   ;;  %s1511_s1 = scalar_lea.vmem [#allocation7], %s877_s24 }
  0xa1   : > { %s293_s4 = scalar_lea.sflag [#allocation8], %s292_s29 }
  0xa2   : > { %1207 = dma.done.wait (%p1937_p7), %s293_s4, 1664  }
  0xa3   : > { %1209 = vsyncadd (%p1937_p7), %s293_s4, 4294965632  ;;  %s911_s8 = smul.u32 40, %s283_s13  ;;  %s879_s25 = sshll.u32 %s283_s13, 3 }
  0xa4   : > { %s311_s17 = scalar_lea.sflag [#allocation11], %s283_s13  ;;  %s1519_s18 = scalar_lea.vmem [#allocation10], %s879_s25 }
  0xa5   : > { %s1517_s9 = scalar_lea.vmem [#allocation9], %s911_s8 }
  0xa6   : > { %1211 = dma.done.wait (%p1937_p7), %s311_s17, 128  }
  0xa7   : > { %1213 = vsyncadd (%p1937_p7), %s311_s17, 4294967168  ;;  %p1938_p5 = scmp.eq.s32.totalorder %s1368_s15, 0 }
  0xa9   : > { %1215 = dma.done.wait (%p1938_p5), [#allocation6], 16   ;;  %p1939_p8 = pmov %p1938_p5 }
  0xab   : > { %1217 = vsyncadd (%p1939_p8), [#allocation6], 4294967280 }
  0xac   : > { %323 = sfence }
  0xad   : > { %p1940_p2 = scmp.ne.s32.totalorder %s1368_s15, 0 }
  0xae   : > { %v1246_v0 = vmov (!%p1940_p2), 0.0  }
  0xaf   : > { %359 = sbr.rel (%p1940_p2) target bundleno = 182 (0xb6), region = 64  ;;  %360 = vst [vmem:[#allocation2] sm:$0xff] (!%p1940_p2), %v1246_v0 }
  0xb6 PF: > { %v361_v1 = vld [vmem:[%s1504_s7] sm:$0xff]  ;;  %v362_v2 = vld [vmem:[%s1504_s7 + $0x8] sm:$0xff]  ;;  %v363_v3 = vld [vmem:[%s1504_s7 + $0x10] sm:$0xff]  ;;  %s1535_s16 = sld [smem:[#allocation12]]  ;;  %s1540_s27 = sld [smem:[#allocation12 + $0x1]] }
  0xb7   : > { %v364_v4 = vld [vmem:[%s1504_s7 + $0x18] sm:$0xff]  ;;  %v882_v5 = vmul.f32 -1.442695, %v361_v1  ;;  %v883_v6 = vmul.f32 -1.442695, %v362_v2  ;;  %v1538_v9 = vld [vmem:[%s1504_s7 + $0x28] sm:$0xff] }
  0xb8   : > { %v397_v7 = vmul.f32 1.442695, %v363_v3  ;;  %v400_v8 = vmul.f32 1.442695, %v364_v4  ;;  %s1542_s14 = sld [smem:[#allocation12 + $0x2]]  ;;  %s1544_s11 = sld [smem:[#allocation12 + $0x3]] }
  0xb9   : > { %989 = vpow2.f32 %v882_v5  ;;  %s1546_s12 = sld [smem:[#allocation12 + $0x4]]  ;;  %v1549_v10 = vld [vmem:[%s1504_s7 + $0x30] sm:$0xff]  ;;  %s1551_s10 = sld [smem:[#allocation12 + $0x5]]  ;;  %v599_v11 = vand.u32 2147483647, %v1538_v9  ;;  %v1561_v12 = vld [vmem:[%s1504_s7 + $0x38] sm:$0xff] }
  0xba   : > { %991 = vpow2.f32 %v883_v6  ;;  %s1553_s28 = sld [smem:[#allocation12 + $0x6]]  ;;  %s1555_s21 = sld [smem:[#allocation12 + $0x7]]  ;;  %v1572_v14 = vld [vmem:[%s1504_s7 + $0x20] sm:$0xff]  ;;  %v610_v15 = vand.u32 2147483647, %v1549_v10  ;;  %v371_v20 = vld [vmem:[%s1511_s1 + $0x10] sm:$0xff] }
  0xbb   : > { %993 = vpow2.f32 %v397_v7  ;;  %s1557_s26 = sld [smem:[#allocation12 + $0x8]]  ;;  %s1563_s6 = sld [smem:[#allocation12 + $0x9]]  ;;  %v600_v13 = vsub.f32 0.0, %v599_v11  ;;  %v622_v18 = vand.u32 2147483647, %v1561_v12  ;;  %v372_v21 = vld [vmem:[%s1511_s1 + $0x18] sm:$0xff] }
  0xbc   : > { %995 = vpow2.f32 %v400_v8  ;;  %s1565_s23 = sld [smem:[#allocation12 + $0xa]]  ;;  %s1567_s30 = sld [smem:[#allocation12 + $0xb]]  ;;  %v634_v24 = vand.u32 2147483647, %v1572_v14  ;;  %v379_v26 = vld [vmem:[%s1517_s9 + $0x10] sm:$0xff]  ;;  %v611_v27 = vsub.f32 0.0, %v610_v15  ;;  %v578_v38 = vmul.f32 %v372_v21, %v371_v20 }
  0xbd   : > { %s1569_s13 = sld [smem:[#allocation12 + $0xc]]  ;;  %s1575_s0 = sld [smem:[#allocation12 + $0xd]]  ;;  %v601_v17 = vmul.f32 1.442695, %v600_v13  ;;  %v380_v29 = vld [vmem:[%s1517_s9 + $0x18] sm:$0xff]  ;;  %v563_v30 = vmul.f32 0.5, %v371_v20 }
  0xbe   : > { %s416_s24 = smul.f32 0.5, %s1542_s14  ;;  %v566_v31 = vmul.f32 0.5, %v372_v21  ;;  %v623_v32 = vsub.f32 0.0, %v622_v18  ;;  %v369_v33 = vld [vmem:[%s1511_s1] sm:$0xff]  ;;  %v370_v34 = vld [vmem:[%s1511_s1 + $0x8] sm:$0xff]  ;;  %v635_v36 = vsub.f32 0.0, %v634_v24 }
  0xbf   : > { %s419_s29 = smul.f32 0.5, %s1544_s11  ;;  %p439_p11 = scmp.gt.f32.partialorder %s1546_s12, 0.5  ;;  %997 = vpow2.f32 %v601_v17  ;;  %v596_v39 = vmax.f32 %v1538_v9, 0.0  ;;  %v612_v40 = vmul.f32 1.442695, %v611_v27  ;;  %v1626_v41 = vsub.f32 %v369_v33, %v563_v30  ;;  %v377_v53 = vld [vmem:[%s1517_s9] sm:$0xff] }
  0xc0   : > { %s1584_s7 = ssub.f32 %s1535_s16, %s416_s24  ;;  %s452_s25 = smul.f32 0.5, %s1555_s21  ;;  %v1628_v42 = vadd.f32 %v563_v30, %v369_v33  ;;  %v1630_v43 = vsub.f32 %v370_v34, %v566_v31  ;;  %v624_v44 = vmul.f32 1.442695, %v623_v32  ;;  %v1644_v48 = vadd.f32 %v566_v31, %v370_v34  ;;  %v378_v58 = vld [vmem:[%s1517_s9 + $0x8] sm:$0xff]  ;;  %v1724_v27 = vld [vmem:[%s1517_s9 + $0x20] sm:$0xff] }
  0xc1   : > { %s1589_s8 = sadd.f32 %s416_s24, %s1535_s16  ;;  %p475_p1 = scmp.gt.f32.partialorder %s1563_s6, 0.5  ;;  %v636_v52 = vmul.f32 1.442695, %v635_v36  ;;  %vm410_vm1 = vcmp.eq.f32.partialorder %v1724_v27, 0.0  ;;  %vm484_vm11 = vcmp.eq.f32.partialorder %v1724_v27, 1.0 }
  0xc2   : > { %s1595_s17 = ssub.f32 %s1540_s27, %s419_s29  ;;  %s1941_s12 = smul.f32 0.5, %s1557_s26  ;;  %v424_v46 = vstv %s1584_s7 }
  0xc3   : > { %v990_v16 = vpop.eup %989  ;;  %s1600_s16 = sadd.f32 %s1540_s27, %s419_s29  ;;  %s1617_s29 = sld [smem:[#allocation12 + $0xe]]  ;;  %v422_v50 = vstv %s1589_s8 }
  0xc4   : > { %v992_v19 = vpop.eup %991  ;;  %v386_v22 = vadd.f32 1.0, %v990_v16  ;;  %s1608_s2 = scalar_select %p439_p11, 1, 0  ;;  %v430_v56 = vstv %s1595_s17 }
  0xc5   : > { %v392_v23 = vadd.f32 1.0, %v992_v19  ;;  %v994_v25 = vpop.eup %993  ;;  %s1611_s4 = ssub.f32 %s1551_s10, %s452_s25  ;;  %s490_s3 = smul.f32 0.5, %s1569_s13  ;;  %v428_v55 = vstv %s1600_s16 }
  0xc6   : > { %999 = vrcp.f32 %v386_v22  ;;  %v996_v28 = vpop.eup %995  ;;  %v399_v35 = vmul.f32 %v994_v25, %v379_v26  ;;  %s1615_s27 = sadd.f32 %s1551_s10, %s452_s25  ;;  %s1942_s10 = smul.f32 %s1544_s11, %s1542_s14  ;;  %v443_v60 = vstv %s1608_s2 }
  0xc7   : > { %1001 = vrcp.f32 %v392_v23  ;;  %v402_v37 = vmul.f32 %v996_v28, %v380_v29  ;;  %s1623_s24 = ssub.f32 %s1553_s28, %s1941_s12  ;;  %s1943_s25 = smov %s1941_s12  ;;  %v460_v61 = vstv %s1611_s4  ;;  %vm1732_vm0 = vcmp.eq.s32.totalorder %v443_v60, 1 }
  0xc8   : > { %v436_v47 = vstv %s1942_s10  ;;  %s1641_s12 = sadd.f32 %s1553_s28, %s1943_s25  ;;  %s493_s20 = smul.f32 0.5, %s1575_s0  ;;  %v403_v49 = vmul.f32 0.5, %v399_v35  ;;  %1003 = vpow2.f32 %v612_v40  ;;  %v458_v63 = vstv %s1615_s27 }
  0xc9   : > { %v1632_v45 = vmul.f32 %v402_v37, %v399_v35  ;;  %s1944_s19 = smul.f32 %s1557_s26, %s1555_s21  ;;  %v406_v54 = vmul.f32 0.5, %v402_v37  ;;  %s1658_s14 = ssub.f32 %s1565_s23, %s490_s3  ;;  %v998_v57 = vpop.eup %997  ;;  %1005 = vpow2.f32 %v624_v44  ;;  %v466_v6 = vstv %s1623_s24 }
  0xca   : > { %s1652_s22 = scalar_select %p475_p1, 1, 0  ;;  %v464_v5 = vstv %s1641_s12  ;;  %1007 = vpow2.f32 %v636_v52  ;;  %v603_v13 = vadd.f32 1.0, %v998_v57 }
  0xcb   : > { %v472_v51 = vstv %s1944_s19  ;;  %s509_s11 = smul.f32 %s1575_s0, %s1569_s13  ;;  %v1664_v59 = vadd.f32 %v436_v47, %v1632_v45  ;;  %s1669_s19 = sadd.f32 %s1565_s23, %s490_s3  ;;  %v1681_v2 = vadd.f32 %v578_v38, %v1632_v45  ;;  %v498_v11 = vstv %s1658_s14 }
  0xcc   : > { %v1673_v0 = vadd.f32 %v472_v51, %v1632_v45  ;;  %s1678_s28 = ssub.f32 %s1567_s30, %s493_s20  ;;  %p513_p3 = scmp.gt.f32.partialorder %s1617_s29, 0.5  ;;  %v479_v8 = vstv %s1652_s22  ;;  %1009 = vlog2.f32 %v603_v13 }
  0xcd   : > { %v510_v1 = vstv %s509_s11  ;;  %s1688_s2 = sadd.f32 %s1567_s30, %s493_s20  ;;  %s1693_s3 = sld [smem:[#allocation12 + $0xf]]  ;;  %v496_v17 = vstv %s1669_s19  ;;  %vm1745_vm2 = vcmp.eq.s32.totalorder %v479_v8, 1 }
  0xce   : > { %v1701_v18 = vadd.f32 %v510_v1, %v1632_v45  ;;  %s1703_s20 = sld [smem:[#allocation12 + $0x11]]  ;;  %s1705_s21 = sld [smem:[#allocation12 + $0x12]]  ;;  %v504_v22 = vstv %s1678_s28 }
  0xcf   : > { %v502_v21 = vstv %s1688_s2  ;;  %s1713_s22 = sld [smem:[#allocation12 + $0x10]]  ;;  %s1738_s9 = sld [smem:[#allocation12 + $0x13]] }
  0xd0   : > { %v1000_v62 = vpop.eup %999  ;;  %s1721_s26 = scalar_select %p513_p3, 1, 0 }
  0xd1   : > { %v1002_v3 = vpop.eup %1001  ;;  %v395_v4 = vadd.f32 %v1000_v62, %v377_v53  ;;  %p905_p13 = scmp.ne.s32.totalorder %s1368_s15, 1 }
  0xd2   : > { %v396_v7 = vadd.f32 %v1002_v3, %v378_v58  ;;  %v1004_v36 = vpop.eup %1003  ;;  %v517_v52 = vstv %s1721_s26 }
  0xd3   : > { %v1695_v15 = vsub.f32 %v395_v4, %v403_v49  ;;  %v1697_v16 = vadd.f32 %v403_v49, %v395_v4  ;;  %v1740_v47 = vpop.eup %1005  ;;  %vm1760_vm3 = vcmp.eq.s32.totalorder %v517_v52, 1  ;;  %v614_v8 = vadd.f32 1.0, %v1004_v36 }
  0xd4   : > { %v1707_v19 = vsub.f32 %v396_v7, %v406_v54  ;;  %v1709_v20 = vadd.f32 %v406_v54, %v396_v7  ;;  %s527_s6 = smul.f32 0.5, %s1703_s20  ;;  %v1008_v58 = vpop.eup %1007 }
  0xd5   : > { %v423_v23 = vmin.f32 %v422_v50, %v1697_v16  ;;  %v425_v24 = vmax.f32 %v424_v46, %v1695_v15  ;;  %v459_v25 = vmin.f32 %v458_v63, %v1697_v16  ;;  %v461_v26 = vmax.f32 %v460_v61, %v1695_v15  ;;  %s530_s23 = smul.f32 0.5, %s1705_s21  ;;  %p550_p9 = scmp.gt.f32.partialorder %s1738_s9, 0.5 }
  0xd6   : > { %v429_v28 = vmin.f32 %v428_v55, %v1709_v20  ;;  %v431_v29 = vmax.f32 %v430_v56, %v1707_v19  ;;  %v465_v30 = vmin.f32 %v464_v5, %v1709_v20  ;;  %v467_v31 = vmax.f32 %v466_v6, %v1707_v19  ;;  %s528_s30 = ssub.f32 %s1693_s3, %s527_s6  ;;  %s546_s7 = smul.f32 %s1705_s21, %s1703_s20 }
  0xd7   : > { %v426_v32 = vsub.f32 %v423_v23, %v425_v24  ;;  %v462_v33 = vsub.f32 %v459_v25, %v461_v26  ;;  %v497_v34 = vmin.f32 %v496_v17, %v1697_v16  ;;  %v499_v35 = vmax.f32 %v498_v11, %v1695_v15  ;;  %s529_s13 = sadd.f32 %s1693_s3, %s527_s6 }
  0xd8   : > { %v432_v37 = vsub.f32 %v429_v28, %v431_v29  ;;  %v468_v40 = vsub.f32 %v465_v30, %v467_v31  ;;  %v503_v44 = vmin.f32 %v502_v21, %v1709_v20  ;;  %v505_v46 = vmax.f32 %v504_v22, %v1707_v19  ;;  %s531_s0 = ssub.f32 %s1713_s22, %s530_s23 }
  0xd9   : > { %v427_v49 = vmax.f32 %v426_v32, 0.0  ;;  %v463_v50 = vmax.f32 %v462_v33, 0.0  ;;  %v500_v51 = vsub.f32 %v497_v34, %v499_v35  ;;  %v569_v57 = vmin.f32 %v1697_v16, %v1628_v42  ;;  %s532_s4 = sadd.f32 %s1713_s22, %s530_s23 }
  0xda   : > { %v433_v53 = vmax.f32 %v432_v37, 0.0  ;;  %v469_v54 = vmax.f32 %v468_v40, 0.0  ;;  %v506_v56 = vsub.f32 %v503_v44, %v505_v46  ;;  %v570_v61 = vmax.f32 %v1695_v15, %v1626_v41  ;;  %v374_v40 = vld [vmem:[%s1511_s1 + $0x28] sm:$0xff]  ;;  %s1790_s8 = scalar_select %p550_p9, 1, 0 }
  0xdb   : > { %v501_v60 = vmax.f32 %v500_v51, 0.0  ;;  %v573_v62 = vmin.f32 %v1709_v20, %v1644_v48  ;;  %v574_v63 = vmax.f32 %v1707_v19, %v1630_v43  ;;  %v535_v6 = vstv %s528_s30  ;;  %v1804_v51 = vld [vmem:[%s1511_s1 + $0x20] sm:$0xff] }
  0xdc   : > { %v434_v1 = vmul.f32 %v433_v53, %v427_v49  ;;  %v470_v3 = vmul.f32 %v469_v54, %v463_v50  ;;  %v507_v4 = vmax.f32 %v506_v56, 0.0  ;;  %v571_v7 = vsub.f32 %v569_v57, %v570_v61  ;;  %v1010_v50 = vpop.eup %1009 }
  0xdd   : > { %v533_v22 = vstv %s529_s13  ;;  %v536_v13 = vmax.f32 %v535_v6, %v1695_v15  ;;  %v541_v24 = vstv %s531_s0  ;;  %v575_v25 = vsub.f32 %v573_v62, %v574_v63  ;;  %v382_v6 = vld [vmem:[%s1519_s18] sm:$0xff] }
  0xde   : > { %v438_v11 = vsub.f32 %v1664_v59, %v434_v1  ;;  %v474_v17 = vsub.f32 %v1673_v0, %v470_v3  ;;  %v508_v21 = vmul.f32 %v507_v4, %v501_v60  ;;  %v534_v23 = vmin.f32 %v533_v22, %v1697_v16 }
  0xdf   : > { %v539_v30 = vstv %s532_s4  ;;  %v542_v0 = vmax.f32 %v541_v24, %v1707_v19  ;;  %v547_v32 = vstv %s546_s7  ;;  %v583_v34 = vmax.f32 %v1697_v16, %v1628_v42 }
  0xe0   : > { %v440_v26 = vmul.f32 0.5, %v438_v11  ;;  %v476_v28 = vmul.f32 0.5, %v474_v17  ;;  %v512_v29 = vsub.f32 %v1701_v18, %v508_v21  ;;  %v537_v31 = vsub.f32 %v534_v23, %v536_v13 }
  0xe1   : > { %v540_v59 = vmin.f32 %v539_v30, %v1709_v20  ;;  %v572_v36 = vmax.f32 %v571_v7, 0.0  ;;  %v576_v37 = vmax.f32 %v575_v25, 0.0  ;;  %v548_v46 = vadd.f32 %v547_v32, %v1632_v45 }
  0xe2   : > { %vm441_vm4 = vcmp.gt.f32.partialorder %v434_v1, %v440_v26  ;;  %vm477_vm5 = vcmp.gt.f32.partialorder %v470_v3, %v476_v28  ;;  %v514_v33 = vmul.f32 0.5, %v512_v29  ;;  %v538_v18 = vmax.f32 %v537_v31, 0.0 }
  0xe3   : > { %vm445_vm6 = vmand %vm1732_vm0, %vm441_vm4  ;;  %v543_v35 = vsub.f32 %v540_v59, %v542_v0  ;;  %v584_v42 = vmin.f32 %v1695_v15, %v1626_v41  ;;  %v587_v16 = vmax.f32 %v1709_v20, %v1644_v48  ;;  %v588_v38 = vmin.f32 %v1707_v19, %v1630_v43  ;;  %v375_v20 = vld [vmem:[%s1511_s1 + $0x30] sm:$0xff] }
  0xe4   : > { %vm1783_vm7 = vmand %vm410_vm1, %vm445_vm6  ;;  %vm515_vm9 = vcmp.gt.f32.partialorder %v508_v21, %v514_v33  ;;  %v1801_v45 = vmul.f32 %v576_v37, %v572_v36  ;;  %1011 = vlog2.f32 %v614_v8  ;;  %v626_v15 = vadd.f32 1.0, %v1740_v47 }
  0xe5   : > { %vm481_vm8 = vmand %vm1745_vm2, %vm477_vm5  ;;  %v544_v49 = vmax.f32 %v543_v35, 0.0  ;;  %v585_v43 = vsub.f32 %v583_v34, %v584_v42  ;;  %v589_v48 = vsub.f32 %v587_v16, %v588_v38  ;;  %v638_v19 = vadd.f32 1.0, %v1008_v58 }
  0xe6   : > { %vm1808_vm10 = vmand %vm410_vm1, %vm481_vm8  ;;  %v580_v53 = vsub.f32 %v1681_v2, %v1801_v45  ;;  %v597_v54 = vmul.f32 %v374_v40, %v1538_v9  ;;  %v554_v55 = vstv %s1790_s8  ;;  %1013 = vlog2.f32 %v626_v15  ;;  %v376_v2 = vld [vmem:[%s1511_s1 + $0x38] sm:$0xff] }
  0xe7   : > { %v545_v52 = vmul.f32 %v544_v49, %v538_v18  ;;  %vm519_vm12 = vmand %vm1760_vm3, %vm515_vm9  ;;  %v586_v56 = vmax.f32 %v585_v43, 0.0  ;;  %v590_v57 = vmax.f32 %v589_v48, 0.0  ;;  %vm560_vm14 = vcmp.eq.f32.partialorder %v1804_v51, 1.0 }
  0xe8   : > { %vm483_vm13 = vmor %vm1783_vm7, %vm1808_vm10  ;;  %1015 = vrcp.f32 %v580_v53  ;;  %v607_v60 = vmax.f32 %v1549_v10, 0.0  ;;  %v608_v61 = vmul.f32 %v375_v20, %v1549_v10  ;;  %vm555_vm0 = vcmp.eq.s32.totalorder %v554_v55, 1 }
  0xe9   : > { %v549_v47 = vsub.f32 %v548_v46, %v545_v52  ;;  %vm520_vm15 = vmand %vm484_vm11, %vm519_vm12  ;;  %v591_v58 = vmul.f32 %v590_v57, %v586_v56  ;;  %1017 = vlog2.f32 %v638_v19  ;;  %v1247_v63 = vmov 0.0  }
  0xea   : > { %v903_v1 = vsel %vm560_vm14, 1.0, %v1247_v63  ;;  %v598_v3 = vsub.f32 %v596_v39, %v597_v54  ;;  %v605_v4 = vmul.f32 0.6931472, %v1010_v50  ;;  %vm521_vm1 = vmor %vm483_vm13, %vm520_vm15  ;;  %v619_v10 = vmax.f32 %v1561_v12, 0.0 }
  0xeb   : > { %v551_v62 = vmul.f32 0.5, %v549_v47  ;;  %1019 = vrcp.f32 %v591_v58  ;;  %v620_v5 = vmul.f32 %v376_v2, %v1561_v12  ;;  %v609_v7 = vsub.f32 %v607_v60, %v608_v61 }
  0xec   : > { %v631_v9 = vmax.f32 %v1572_v14, 0.0  ;;  %v632_v39 = vmul.f32 %v903_v1, %v1572_v14  ;;  %v606_v11 = vadd.f32 %v605_v4, %v598_v3  ;;  %v654_v12 = vrot.slane %v903_v1, 4 }
  0xed   : > { %vm552_vm2 = vcmp.gt.f32.partialorder %v545_v52, %v551_v62  ;;  %v621_v22 = vsub.f32 %v619_v10, %v620_v5  ;;  %v592_v25 = vsub.f32 %v591_v58, %v580_v53  ;;  %vm681_vm8 = vcmask 1040384   ;;  %v680_v10 = vld [vmem:[#allocation2] sm:$0xff] }
  0xee   : > { %vm556_vm3 = vmand %vm555_vm0, %vm552_vm2  ;;  %v1012_v8 = vpop.eup %1011  ;;  %v633_v28 = vsub.f32 %v631_v9, %v632_v39  ;;  %v655_v33 = vadd.f32 %v903_v1, %v654_v12  ;;  %vm683_vm9 = vcmask 1041408   ;;  %vm685_vm10 = vcmask 1042432  }
  0xef   : > { %vm557_vm4 = vmand %vm484_vm11, %vm556_vm3  ;;  %v616_v17 = vmul.f32 0.6931472, %v1012_v8  ;;  %vm687_vm11 = vcmask 1043456   ;;  %vm689_vm12 = vcmask 1044480  }
  0xf0   : > { %vm558_vm5 = vmor %vm521_vm1, %vm557_vm4  ;;  %v1014_v23 = vpop.eup %1013  ;;  %v656_v46 = vrot.slane %v655_v33, 2 }
  0xf1   : > { %v559_v21 = vsel %vm558_vm5, 0.0, %v382_v6  ;;  %v617_v13 = vadd.f32 %v616_v17, %v609_v7  ;;  %v628_v26 = vmul.f32 0.6931472, %v1014_v23 }
  0xf2   : > { %vm642_vm6 = vcmp.gt.f32.partialorder %v559_v21, 0.5  ;;  %v1016_v24 = vpop.eup %1015  ;;  %v657_v48 = vadd.f32 %v656_v46, %v655_v33 }
  0xf3   : > { %vm643_vm7 = vmor %vm642_vm6, %vm560_vm14  ;;  %v1018_v27 = vpop.eup %1017  ;;  %v618_v29 = vadd.f32 %v617_v13, %v606_v11  ;;  %v582_v14 = vmul.f32 %v1016_v24, %v1801_v45  ;;  %v629_v31 = vadd.f32 %v628_v26, %v621_v22 }
  0xf4   : > { %v904_v30 = vsel %vm643_vm7, 1.0, %v1247_v63  ;;  %v640_v59 = vmul.f32 0.6931472, %v1018_v27  ;;  %v658_v56 = vrot.slane %v657_v48, 1 }
  0xf5   : > { %v674_v0 = vrot.slane %v904_v30, 4  ;;  %v1020_v32 = vpop.eup %1019  ;;  %v630_v18 = vadd.f32 %v629_v31, %v618_v29 }
  0xf6   : > { %v594_v34 = vmul.f32 %v1020_v32, %v592_v25  ;;  %v641_v35 = vadd.f32 %v640_v59, %v633_v28  ;;  %v659_v61 = vadd.f32 %v658_v56, %v657_v48 }
  0xf7   : > { %v660_v37 = vsel %vm560_vm14, %v630_v18, 0.0  ;;  %v675_v44 = vadd.f32 %v904_v30, %v674_v0 }
  0xf8   : > { %v595_v36 = vsub.f32 %v582_v14, %v594_v34  ;;  %v667_v40 = vsel %vm643_vm7, %v641_v35, 0.0  ;;  %v661_v42 = vrot.slane %v660_v37, 4 }
  0xf9   : > { %v668_v16 = vrot.slane %v667_v40, 4  ;;  %v676_v41 = vrot.slane %v675_v44, 2 }
  0xfa   : > { %v646_v38 = vsub.f32 1.0, %v595_v36  ;;  %v662_v49 = vadd.f32 %v661_v42, %v660_v37 }
  0xfb   : > { %v669_v45 = vadd.f32 %v668_v16, %v667_v40  ;;  %v677_v54 = vadd.f32 %v676_v41, %v675_v44 }
  0xfc   : > { %v647_v50 = vsel %vm560_vm14, %v646_v38, 0.0  ;;  %v663_v15 = vrot.slane %v662_v49, 2  ;;  %vm728_vm14 = vcmask (!%p905_p13), 1025  }
  0xfd   : > { %v648_v43 = vrot.slane %v647_v50, 4  ;;  %v670_v19 = vrot.slane %v669_v45, 2  ;;  %v678_v58 = vrot.slane %v677_v54, 1 }
  0xfe   : > { %v664_v52 = vadd.f32 %v663_v15, %v662_v49 }
  0xff   : > { %v649_v20 = vadd.f32 %v648_v43, %v647_v50  ;;  %v671_v53 = vadd.f32 %v670_v19, %v669_v45  ;;  %v679_v1 = vadd.f32 %v678_v58, %v677_v54 }
 0x100   : > { %v665_v57 = vrot.slane %v664_v52, 1 }
 0x101   : > { %v650_v55 = vrot.slane %v649_v20, 2  ;;  %v672_v2 = vrot.slane %v671_v53, 1 }
 0x102   : > { %v666_v62 = vadd.f32 %v665_v57, %v664_v52 }
 0x103   : > { %v651_v47 = vadd.f32 %v650_v55, %v649_v20  ;;  %v673_v63 = vadd.f32 %v672_v2, %v671_v53 }
 0x105   : > { %v652_v60 = vrot.slane %v651_v47, 1 }
 0x107   : > { %v653_v51 = vadd.f32 %v652_v60, %v651_v47 }
 0x109   : > { %v682_v3 = vsel %vm681_vm8, %v653_v51, %v659_v61 }
 0x10a   : > { %v684_v4 = vsel %vm683_vm9, %v682_v3, %v666_v62  ;;  %696 = sbr.rel (%p905_p13) target bundleno = 453 (0x1c5), region = 68 }
 0x10b   : > { %v686_v5 = vsel %vm685_vm10, %v684_v4, %v673_v63 }
 0x10c   : > { %v688_v6 = vsel %vm687_vm11, %v686_v5, %v679_v1 }
 0x10d   : > { %v690_v7 = vsel %vm689_vm12, %v688_v6, 0.0 }
 0x10e   : > { %v691_v8 = vadd.f32 %v690_v7, %v680_v10 }
 0x110   : > { %692 = vst [vmem:[#allocation2] sm:$0xff] %v691_v8 }
 0x117   : > { %v697_v9 = vld [vmem:[#allocation2] sm:$0xff] }
 0x118   : > { %698 = vadd.xlane.f32.xlu0 %v697_v9 }
 0x1a5   : > { %v699_v39 = vpop.xlane.xlu0 %698 }
 0x1a6   : > { %v700_v11 = vmax.f32 %v699_v39, 1.0  ;;  %vm712_vm13 = vcmp.gt.f32.partialorder %v699_v39, 0.0 }
 0x1a8   : > { %v702_v17 = vrot.slane %v700_v11, 1  ;;  %v706_v21 = vmul.f32 3.0, %v700_v11 }
 0x1aa   : > { %1021 = vrcp.f32 %v702_v17  ;;  %v708_v22 = vrot.slane %v706_v21, 7 }
 0x1ac   : > { %1023 = vrcp.f32 %v708_v22 }
 0x1b4   : > { %v1022_v23 = vpop.eup %1021 }
 0x1b5   : > { %v705_v12 = vmul.f32 %v1022_v23, %v699_v39 }
 0x1b6   : > { %v1024_v13 = vpop.eup %1023 }
 0x1b7   : > { %v711_v24 = vmul.f32 %v1024_v13, %v699_v39  ;;  %v713_v26 = vmul.f32 0.05, %v705_v12  ;;  %v723_v27 = vmul.f32 0.1183432, %v705_v12 }
 0x1b9   : > { %v714_v25 = vmul.f32 0.0375, %v711_v24  ;;  %v725_v14 = vrot.slane %v723_v27, 2 }
 0x1bb   : > { %v716_v28 = vrot.slane %v714_v25, 2 }
 0x1bd   : > { %v718_v29 = vadd.f32 %v716_v28, %v713_v26 }
 0x1bf   : > { %v720_v30 = vrot.slane %v718_v29, 7 }
 0x1c1   : > { %v722_v31 = vsel %vm712_vm13, %v720_v30, 0.0 }
 0x1c2   : > { %v727_v59 = vadd.f32 %v725_v14, %v722_v31 }
 0x1c4   : > { %729 = vst.msk [vmem:[#allocation13 - $0x1] sm:$0x2] %vm728_vm14, %v727_v59 }
 0x1c5 PF: > { %p948_p10 = scmp.eq.s32.totalorder %s1368_s15, 1  ;;  %s1248_s1 = smov [#allocation13]  }
 0x1c6   : > { %s737_s18 = sshll.u32 %s1248_s1, 4  ;;  %s738_s18 = int_to_ptr.vmem [resolvable:$true] %s737_s18 }
 0x1c7   : > { %s1160_s17 = scalar_lea.vmem %s738_s18, 16  ;;  %s1166_s16 = scalar_lea.vmem %s738_s18, 32 }
 0x1c8   : > { %p1161_p0 = scmp.ne.s32.totalorder %s738_s18, %s1160_s17  ;;  %p1167_p4 = scmp.lt.s32.totalorder %s738_s18, %s738_s18 }
 0x1c9   : > { %p1168_p7 = scmp.lt.s32.totalorder %s1166_s16, %s1160_s17 }
 0x1ca   : > { %p1162_p6 = pnand %p1161_p0, %p948_p10 }
 0x1cb   : > { %p1169_p5 = por %p1168_p7, %p1167_p4 }
 0x1cc   : > { %p1163_p12 = pneg %p1162_p6 }
 0x1ce   : > { %p1170_p8 = pnand %p1169_p5, %p1163_p12 }
 0x1d0   : > { %1173 = shalt.err (!%p1170_p8)
}
 0x1d1   : > { %s1174_s29 = scalar_lea.hbm %s1897_s5, 16 }
 0x1d2   : > { %p1175_p2 = scmp.ne.s32.totalorder %s1897_s5, %s1174_s29  ;;  %p1180_p3 = scmp.lt.u32.totalorder %s1174_s29, %s1897_s5 }
 0x1d4   : > { %p1176_p11 = pnand %p1175_p2, %p948_p10 }
 0x1d6   : > { %p1177_p1 = pneg %p1176_p11 }
 0x1d8   : > { %p1182_p9 = pnand %p1180_p3, %p1177_p1 }
 0x1da   : > { %1185 = shalt.err (!%p1182_p9)
}
 0x1db   : > { %925 = dma.vmem_to_hbm [thread:$0]  (%p948_p10), %s738_s18, 16, %s1897_s5, [#allocation5]  }
 0x1dc   : > { %1219 = dma.done.wait (%p948_p10), [#allocation5], 16  }
 0x1dd   : > { %1221 = vsyncadd (%p948_p10), [#allocation5], 4294967280 }
 0x1de PF: > { %s1955_s21 = sld [smem:[#allocation21_spill]]  ;;  %s1956_s18 = sld [smem:[#allocation19_spill]] }
 0x1df   : > { %s1957_s19 = sld [smem:[#allocation20_spill]]  ;;  %s1958_s20 = sld [smem:[#allocation22_spill]] }
 0x1e4   : > { %p23_p13 = scmp.ge.s32.totalorder %s1955_s21, 4  }
 0x1e6   :  { %25 = sbr.rel (!%p23_p13) target bundleno = 15 (0xf), region = 127 }
 0x1ed   :  { %750 = vsyncpa [#allocation4], 1 }
 0x1ee   :  { %752 = vsyncpa [#allocation4 + $0x1], 1 }
 0x1ef   :  { %753 = vsyncpa [#allocation8], 1 }
 0x1f0   :  { %755 = vsyncpa [#allocation8 + $0x1], 1 }
 0x1f1   :  { %756 = vsyncpa [#allocation11], 1 }
 0x1f2   :  { %758 = vsyncpa [#allocation11 + $0x1], 1 }
 0x1f3   :  { %759 = vsyncpa [#allocation5], 1 }
 0x1f4   :  { %761 = vsyncpa [#allocation5 + $0x1], 1 }
 0x1f5   :  { %762 = vsyncpa [#allocation6], 1 }
 0x1f6   :  { %764 = vsyncpa [#allocation6 + $0x1], 1 }

</bundles_post_ra>
